<compile_context>
chip_gen: v7x
topology: tpu7x:2x2x1
jax: 0.10.0
libtpu: 0.0.40
codegen_flags: <defaults>
</compile_context>

<pallas_src>
import jax
import jax.numpy as jnp
from jax.experimental import pallas as pl
from jax.experimental.pallas import tpu as pltpu


def _round_up(x: int, n: int) -> int:
    return (x + n - 1) // n * n


# --------------------------------- kernel ------------------------------------
def mlp_kernel(x_ref, w1_ref, b1_ref, w2_ref, b2_ref, o_ref, acc_ref):
    # Grid: (row_tiles, hidden_tiles).  Axis 1 (hidden) is the fc2 reduction
    # axis, accumulated into the f32 VMEM scratch `acc_ref`.
    h = pl.program_id(1)

    @pl.when(h == 0)
    def _():
        acc_ref[...] = jnp.zeros_like(acc_ref)

    # fc1 for this hidden tile: bf16 operands (x pre-cast in the wrapper),
    # f32 MXU accumulation; bias + GELU in f32.
    h1 = jnp.dot(x_ref[...], w1_ref[...],
                 preferred_element_type=jnp.float32) + b1_ref[...]
    g = jax.nn.gelu(h1, approximate=True)   # == nn.GELU(approximate='tanh')

    # Partial fc2 contribution of this hidden tile.
    acc_ref[...] += jnp.dot(g.astype(jnp.bfloat16), w2_ref[...],
                            preferred_element_type=jnp.float32)

    @pl.when(h == pl.num_programs(1) - 1)
    def _():
        o_ref[...] = (acc_ref[...] + b2_ref[...]).astype(o_ref.dtype)


# -------------------------------- wrapper -------------------------------------
def mlp_forward(x, w1, b1, w2, b2, *, tm=512, th=512):
    """x: (..., D_in); w1: (D_in, H); b1: (H,)/(1,H); w2: (H, D_out); b2: (D_out,)/(1,D_out).

    For best perf, pass w1/w2 already in bf16 (cast hoisted out of the call)."""
    lead = x.shape[:-1]
    d_in = x.shape[-1]
    m = 1
    for s in lead:
        m *= s
    x2 = x.reshape(m, d_in)

    hidden = w1.shape[1]
    d_out = w2.shape[1]

    # ---- tile selection: rows ----
    m_r = _round_up(m, 128)
    tm = min(tm, m_r)
    # Keep >=2 row tiles when possible so v7x's 2 TensorCores both get work.
    if m_r // tm < 2 and m_r >= 256:
        tm = _round_up(m_r // 2, 128)
    m_pad = _round_up(m, tm)

    # ---- tile selection: hidden (fc2 reduction axis) ----
    h_r = _round_up(hidden, 128)
    th = min(th, h_r)
    h_pad = _round_up(hidden, th)

    # ---- operand prep (casts/padding happen once per call, outside the grid) ----
    xb = x2.astype(jnp.bfloat16)
    if m_pad != m:
        xb = jnp.pad(xb, ((0, m_pad - m), (0, 0)))

    w1b = w1 if w1.dtype == jnp.bfloat16 else w1.astype(jnp.bfloat16)
    w2b = w2 if w2.dtype == jnp.bfloat16 else w2.astype(jnp.bfloat16)
    b1f = b1.reshape(1, hidden).astype(jnp.float32)
    b2f = b2.reshape(1, d_out).astype(jnp.float32)
    if h_pad != hidden:
        # Zero-padded w1 columns / b1 -> GELU(0)=0, and zero-padded w2 rows
        # make the padded hidden region contribute exactly 0 to fc2.
        w1b = jnp.pad(w1b, ((0, 0), (0, h_pad - hidden)))
        b1f = jnp.pad(b1f, ((0, 0), (0, h_pad - hidden)))
        w2b = jnp.pad(w2b, ((0, h_pad - hidden), (0, 0)))

    grid = (m_pad // tm, h_pad // th)

    cost = pl.CostEstimate(
        flops=2 * m_pad * h_pad * (d_in + d_out),
        transcendentals=m_pad * h_pad,
        bytes_accessed=(xb.size * 2 + w1b.size * 2 + w2b.size * 2
                        + b1f.size * 4 + b2f.size * 4 + m_pad * d_out * 4),
    )

    out = pl.pallas_call(
        mlp_kernel,
        out_shape=jax.ShapeDtypeStruct((m_pad, d_out), x.dtype),
        grid=grid,
        in_specs=[
            pl.BlockSpec((tm, d_in), lambda i, h: (i, 0)),       # x rows (resident over h)
            pl.BlockSpec((d_in, th), lambda i, h: (0, h)),       # fc1 weight hidden-tile
            pl.BlockSpec((1, th), lambda i, h: (0, h)),          # fc1 bias (lane-dense)
            pl.BlockSpec((th, d_out), lambda i, h: (h, 0)),      # fc2 weight hidden-tile
            pl.BlockSpec((1, d_out), lambda i, h: (0, 0)),       # fc2 bias (lane-dense)
        ],
        out_specs=pl.BlockSpec((tm, d_out), lambda i, h: (i, 0)),
        scratch_shapes=[pltpu.VMEM((tm, d_out), jnp.float32)],
        compiler_params=pltpu.CompilerParams(
            dimension_semantics=("parallel", "arbitrary")),
        cost_estimate=cost,
    )(xb, w1b, b1f, w2b, b2f)

    if m_pad != m:
        out = out[:m]
    return out.reshape(*lead, d_out)


# ------------------------------ reference ------------------------------------
def mlp_ref(x, w1, b1, w2, b2):
    h = jnp.dot(x, w1) + b1.reshape(1, -1)
    g = jax.nn.gelu(h, approximate=True)
    return jnp.dot(g, w2) + b2.reshape(1, -1)


# --------------------------------- main ---------------------------------------
if __name__ == "__main__":
    key = jax.random.PRNGKey(0)

    def make_params(k, d_in, hidden, d_out):
        k1, k2 = jax.random.split(k)
        # Kaiming-normal (fan_in, relu) init like the module.
        w1 = jax.random.normal(k1, (d_in, hidden), jnp.float32) * (2.0 / d_in) ** 0.5
        b1 = jnp.zeros((hidden,), jnp.float32)
        w2 = jax.random.normal(k2, (hidden, d_out), jnp.float32) * (2.0 / hidden) ** 0.5
        b2 = jnp.zeros((d_out,), jnp.float32)
        return w1, b1, w2, b2

    # --- test 1: nicely divisible small shapes ---
    B, T = 2, 64
    D_IN, HIDDEN, D_OUT = 256, 512, 256    # scaled down from 1152 / 4304 / 1152
    kx, kp, kx2, kp2 = jax.random.split(key, 4)
    w1, b1, w2, b2 = make_params(kp, D_IN, HIDDEN, D_OUT)
    x = jax.random.normal(kx, (B, T, D_IN), jnp.float32)

    # Hoist the weight bf16 cast out of the forward call (done once here).
    w1b, w2b = w1.astype(jnp.bfloat16), w2.astype(jnp.bfloat16)

    out = jax.block_until_ready(mlp_forward(x, w1b, b1, w2b, b2))
    assert out.shape == (B, T, D_OUT), out.shape
    ref = mlp_ref(x.reshape(-1, D_IN), w1, b1, w2, b2).reshape(B, T, D_OUT)
    assert jnp.allclose(out, ref, rtol=3e-2, atol=3e-2), float(jnp.max(jnp.abs(out - ref)))

    # --- test 2: awkward shapes exercising row / hidden zero-padding ---
    B2, T2 = 2, 37
    D_IN2, HIDDEN2, D_OUT2 = 256, 200, 128  # hidden not a multiple of 128
    w1_, b1_, w2_, b2_ = make_params(kp2, D_IN2, HIDDEN2, D_OUT2)
    x_ = jax.random.normal(kx2, (B2, T2, D_IN2), jnp.float32)

    out2 = jax.block_until_ready(
        mlp_forward(x_, w1_.astype(jnp.bfloat16), b1_, w2_.astype(jnp.bfloat16), b2_))
    assert out2.shape == (B2, T2, D_OUT2), out2.shape
    ref2 = mlp_ref(x_.reshape(-1, D_IN2), w1_, b1_, w2_, b2_).reshape(B2, T2, D_OUT2)
    assert jnp.allclose(out2, ref2, rtol=3e-2, atol=3e-2), float(jnp.max(jnp.abs(out2 - ref2)))

    print("KERNEL_OK")
</pallas_src>

<mosaic_0001>
module attributes {stable_mosaic.version = 11 : i64} {
  func.func @mlp_kernel(%arg0: i32, %arg1: i32, %arg2: memref<128x256xbf16, #tpu.memory_space<vmem>>, %arg3: memref<256x512xbf16, #tpu.memory_space<vmem>>, %arg4: memref<1x512xf32, #tpu.memory_space<vmem>>, %arg5: memref<512x256xbf16, #tpu.memory_space<vmem>>, %arg6: memref<1x256xf32, #tpu.memory_space<vmem>>, %arg7: memref<128x256xf32, #tpu.memory_space<vmem>>, %arg8: memref<128x256xf32, #tpu.memory_space<vmem>>) attributes {dimension_semantics = [#tpu.dimension_semantics<parallel>, #tpu.dimension_semantics<arbitrary>], iteration_bounds = array<i64: 1, 1>, scalar_prefetch = 0 : i64, scratch_operands = 1 : i64, tpu.core_type = #tpu.core_type<tc>, window_params = [{transform_indices = @transform_0, window_bounds = array<i64: 128, 256>}, {transform_indices = @transform_1, window_bounds = array<i64: 256, 512>}, {transform_indices = @transform_2, window_bounds = array<i64: 1, 512>}, {transform_indices = @transform_3, window_bounds = array<i64: 512, 256>}, {pipeline_mode = #tpu.pipeline_mode<synchronous>, transform_indices = @transform_4, window_bounds = array<i64: 1, 256>}, {transform_indices = @transform_5, window_bounds = array<i64: 128, 256>}]} {
    %c0_i32 = arith.constant 0 : i32
    %0 = arith.cmpi eq, %arg1, %c0_i32 : i32
    %1 = arith.extui %0 : i1 to i32
    %c0_i32_0 = arith.constant 0 : i32
    %2 = arith.cmpi ne, %1, %c0_i32_0 : i32
    scf.if %2 {
      %cst_19 = arith.constant 0.000000e+00 : f32
      %31 = vector.broadcast %cst_19 : f32 to vector<128x256xf32>
      %c0_20 = arith.constant 0 : index
      %c0_21 = arith.constant 0 : index
      %32 = vector.load %arg8[%c0_20, %c0_21] : memref<128x256xf32, #tpu.memory_space<vmem>>, vector<128x256xf32>
      tpu.vector_store %arg8[%c0_20, %c0_21], %31 {strides = array<i32>} : memref<128x256xf32, #tpu.memory_space<vmem>>, vector<128x256xf32>,
    } else {
    }
    %c0 = arith.constant 0 : index
    %c0_1 = arith.constant 0 : index
    %3 = vector.load %arg2[%c0, %c0_1] : memref<128x256xbf16, #tpu.memory_space<vmem>>, vector<128x256xbf16>
    %c0_2 = arith.constant 0 : index
    %c0_3 = arith.constant 0 : index
    %4 = vector.load %arg3[%c0_2, %c0_3] : memref<256x512xbf16, #tpu.memory_space<vmem>>, vector<256x512xbf16>
    %cst = arith.constant dense<0.000000e+00> : vector<128x512xf32>
    %5 = tpu.matmul %3, %4, %cst {dimension_numbers = #tpu.dot_dimension_numbers<[1], [0], [0], [1], [0, 0, 1, 1], [], []>} : vector<128x256xbf16>, vector<256x512xbf16>, vector<128x512xf32> -> vector<128x512xf32>
    %c0_4 = arith.constant 0 : index
    %c0_5 = arith.constant 0 : index
    %6 = vector.load %arg4[%c0_4, %c0_5] : memref<1x512xf32, #tpu.memory_space<vmem>>, vector<1x512xf32>
    %7 = vector.broadcast %6 : vector<1x512xf32> to vector<128x512xf32>
    %8 = arith.addf %5, %7 : vector<128x512xf32>
    %9 = arith.mulf %8, %8 : vector<128x512xf32>
    %10 = arith.mulf %8, %9 : vector<128x512xf32>
    %cst_6 = arith.constant 4.471500e-02 : f32
    %11 = vector.broadcast %cst_6 : f32 to vector<128x512xf32>
    %12 = arith.mulf %11, %10 : vector<128x512xf32>
    %13 = arith.addf %8, %12 : vector<128x512xf32>
    %cst_7 = arith.constant 0.797884583 : f32
    %14 = vector.broadcast %cst_7 : f32 to vector<128x512xf32>
    %15 = arith.mulf %14, %13 : vector<128x512xf32>
    %16 = math.tanh %15 : vector<128x512xf32>
    %cst_8 = arith.constant 1.000000e+00 : f32
    %17 = vector.broadcast %cst_8 : f32 to vector<128x512xf32>
    %18 = arith.addf %17, %16 : vector<128x512xf32>
    %cst_9 = arith.constant 5.000000e-01 : f32
    %19 = vector.broadcast %cst_9 : f32 to vector<128x512xf32>
    %20 = arith.mulf %19, %18 : vector<128x512xf32>
    %21 = arith.mulf %8, %20 : vector<128x512xf32>
    %c0_10 = arith.constant 0 : index
    %c0_11 = arith.constant 0 : index
    %22 = vector.load %arg8[%c0_10, %c0_11] : memref<128x256xf32, #tpu.memory_space<vmem>>, vector<128x256xf32>
    %23 = arith.truncf %21 : vector<128x512xf32> to vector<128x512xbf16>
    %c0_12 = arith.constant 0 : index
    %c0_13 = arith.constant 0 : index
    %24 = vector.load %arg5[%c0_12, %c0_13] : memref<512x256xbf16, #tpu.memory_space<vmem>>, vector<512x256xbf16>
    %cst_14 = arith.constant dense<0.000000e+00> : vector<128x256xf32>
    %25 = tpu.matmul %23, %24, %cst_14 {dimension_numbers = #tpu.dot_dimension_numbers<[1], [0], [0], [1], [0, 0, 1, 1], [], []>} : vector<128x512xbf16>, vector<512x256xbf16>, vector<128x256xf32> -> vector<128x256xf32>
    %26 = arith.addf %22, %25 : vector<128x256xf32>
    %c0_15 = arith.constant 0 : index
    %c0_16 = arith.constant 0 : index
    %27 = vector.load %arg8[%c0_15, %c0_16] : memref<128x256xf32, #tpu.memory_space<vmem>>, vector<128x256xf32>
    tpu.vector_store %arg8[%c0_15, %c0_16], %26 {strides = array<i32>} : memref<128x256xf32, #tpu.memory_space<vmem>>, vector<128x256xf32>,
    %c0_i32_17 = arith.constant 0 : i32
    %28 = arith.cmpi eq, %arg1, %c0_i32_17 : i32
    %29 = arith.extui %28 : i1 to i32
    %c0_i32_18 = arith.constant 0 : i32
    %30 = arith.cmpi ne, %29, %c0_i32_18 : i32
    scf.if %30 {
      %c0_19 = arith.constant 0 : index
      %c0_20 = arith.constant 0 : index
      %31 = vector.load %arg8[%c0_19, %c0_20] : memref<128x256xf32, #tpu.memory_space<vmem>>, vector<128x256xf32>
      %c0_21 = arith.constant 0 : index
      %c0_22 = arith.constant 0 : index
      %32 = vector.load %arg6[%c0_21, %c0_22] : memref<1x256xf32, #tpu.memory_space<vmem>>, vector<1x256xf32>
      %33 = vector.broadcast %32 : vector<1x256xf32> to vector<128x256xf32>
      %34 = arith.addf %31, %33 : vector<128x256xf32>
      %c0_23 = arith.constant 0 : index
      %c0_24 = arith.constant 0 : index
      %35 = vector.load %arg7[%c0_23, %c0_24] : memref<128x256xf32, #tpu.memory_space<vmem>>, vector<128x256xf32>
      tpu.vector_store %arg7[%c0_23, %c0_24], %34 {strides = array<i32>} : memref<128x256xf32, #tpu.memory_space<vmem>>, vector<128x256xf32>,
    } else {
    }
    return
  }
  func.func @transform_0(%arg0: i32, %arg1: i32) -> (i32, i32) {
    %c0_i32 = arith.constant 0 : i32
    %c0_i32_0 = arith.constant 0 : i32
    return %arg0, %c0_i32 : i32, i32
  }
  func.func @transform_1(%arg0: i32, %arg1: i32) -> (i32, i32) {
    %c0_i32 = arith.constant 0 : i32
    %c0_i32_0 = arith.constant 0 : i32
    return %c0_i32, %arg1 : i32, i32
  }
  func.func @transform_2(%arg0: i32, %arg1: i32) -> (i32, i32) {
    %c0_i32 = arith.constant 0 : i32
    %c0_i32_0 = arith.constant 0 : i32
    return %c0_i32, %arg1 : i32, i32
  }
  func.func @transform_3(%arg0: i32, %arg1: i32) -> (i32, i32) {
    %c0_i32 = arith.constant 0 : i32
    %c0_i32_0 = arith.constant 0 : i32
    return %arg1, %c0_i32 : i32, i32
  }
  func.func @transform_4(%arg0: i32, %arg1: i32) -> (i32, i32) {
    %c0_i32 = arith.constant 0 : i32
    %c0_i32_0 = arith.constant 0 : i32
    %c0_i32_1 = arith.constant 0 : i32
    return %c0_i32, %c0_i32_0 : i32, i32
  }
  func.func @transform_5(%arg0: i32, %arg1: i32) -> (i32, i32) {
    %c0_i32 = arith.constant 0 : i32
    %c0_i32_0 = arith.constant 0 : i32
    return %arg0, %c0_i32 : i32, i32
  }
}

</mosaic_0001>

<bundles_post_ra>
// kernel: tpu_custom_call.1
= control target key start
LH: loop header
LB: loop body
LE: loop exit
PB: predicated region body
PF: predicated region fallthrough
CT: control target
= control target key end

     0   :  { %10 = vsyncpa [#allocation4], 0  ;;  %s3874_s0 = inlined_call_operand.hbm [shape: bf16[128,256], index: 0, kind: input, shape index: {}]   ;;  %s3875_s1 = inlined_call_operand.hbm [shape: bf16[256,512], index: 1, kind: input, shape index: {}]   ;;  %s3876_s2 = inlined_call_operand.vmem [shape: f32[1,512], index: 2, kind: input, shape index: {}]   ;;  %s3877_s3 = inlined_call_operand.hbm [shape: bf16[512,256], index: 3, kind: input, shape index: {}]   ;;  %s3878_s4 = inlined_call_operand.vmem [shape: f32[1,256], index: 4, kind: input, shape index: {}]   ;;  %s3879_s5 = inlined_call_operand.hbm [shape: f32[128,256], index: 5, kind: output, shape index: {}]  }
   0x1   :  { %11 = vsyncpa [#allocation7], 0 }
   0x2   :  { %12 = vsyncpa [#allocation5], 0  ;;  %s2891_s18 = smov [#allocation6]   ;;  %s2797_s22 = scalar_lea.hbm %s3875_s1, 8192 }
   0x3   :  { %s30_s19 = sshll.u32 %s2891_s18, 4  ;;  %p2798_p0 = scmp.ne.s32.totalorder %s3875_s1, %s2797_s22  ;;  %s31_s19 = int_to_ptr.vmem [resolvable:$true] %s30_s19 }
   0x4   :  { %p2801_p1 = scmp.lt.u32.totalorder %s2797_s22, %s3875_s1 }
   0x6   :  { %p2803_p2 = pnand %p2801_p1, %p2798_p0 }
   0x8   :  { %2806 = shalt.err (!%p2803_p2)
}
   0x9   :  { %s2807_s27 = scalar_lea.vmem %s31_s19, 8192  ;;  %p2812_p4 = scmp.lt.s32.totalorder %s31_s19, %s31_s19 }
   0xa   :  { %p2808_p3 = scmp.ne.s32.totalorder %s31_s19, %s2807_s27  ;;  %p2813_p5 = scmp.lt.s32.totalorder %s2807_s27, %s2807_s27 }
   0xc   :  { %p2814_p6 = por %p2813_p5, %p2812_p4 }
   0xe   :  { %p2815_p7 = pnand %p2814_p6, %p2808_p3 }
  0x10   :  { %2818 = shalt.err (!%p2815_p7)
}
  0x11   :  { %s2892_s28 = smov 256   ;;  %s2893_s29 = smov 16  }
  0x12   :  { %36 = dma.hbm_to_vmem [thread:$0]  %s3875_s1, 8192, %s31_s19, [#allocation7], %s2892_s28, %s2892_s28, %s2893_s29  }
  0x13   :  { %s2894_s7 = smov [#allocation3]   ;;  %s2819_s11 = scalar_lea.hbm %s3874_s0, 2048 }
  0x14   :  { %s18_s8 = sshll.u32 %s2894_s7, 4  ;;  %p2820_p8 = scmp.ne.s32.totalorder %s3874_s0, %s2819_s11  ;;  %s19_s8 = int_to_ptr.vmem [resolvable:$true] %s18_s8 }
  0x15   :  { %p2823_p9 = scmp.lt.u32.totalorder %s2819_s11, %s3874_s0 }
  0x17   :  { %p2825_p10 = pnand %p2823_p9, %p2820_p8 }
  0x19   :  { %2828 = shalt.err (!%p2825_p10)
}
  0x1a   :  { %s2829_s16 = scalar_lea.vmem %s19_s8, 2048  ;;  %p2834_p12 = scmp.lt.s32.totalorder %s19_s8, %s19_s8 }
  0x1b   :  { %p2830_p11 = scmp.ne.s32.totalorder %s19_s8, %s2829_s16  ;;  %p2835_p13 = scmp.lt.s32.totalorder %s2829_s16, %s2829_s16 }
  0x1d   :  { %p2836_p0 = por %p2835_p13, %p2834_p12 }
  0x1f   :  { %p2837_p1 = pnand %p2836_p0, %p2830_p11 }
  0x21   :  { %2840 = shalt.err (!%p2837_p1)
}
  0x22   :  { %s2895_s1 = smov 128   ;;  %s2896_s17 = smov 8  }
  0x23   :  { %24 = dma.hbm_to_vmem [thread:$0]  %s3874_s0, 2048, %s19_s8, [#allocation4], %s2895_s1, %s2895_s1, %s2896_s17  }
  0x24   :  { %s2897_s20 = smov [#allocation8]   ;;  %s2841_s24 = scalar_lea.hbm %s3877_s3, 8192 }
  0x25   :  { %s44_s21 = sshll.u32 %s2897_s20, 4  ;;  %p2842_p2 = scmp.ne.s32.totalorder %s3877_s3, %s2841_s24  ;;  %s45_s21 = int_to_ptr.vmem [resolvable:$true] %s44_s21 }
  0x26   :  { %p2845_p3 = scmp.lt.u32.totalorder %s2841_s24, %s3877_s3 }
  0x28   :  { %p2847_p4 = pnand %p2845_p3, %p2842_p2 }
  0x2a   :  { %2850 = shalt.err (!%p2847_p4)
}
  0x2b   :  { %s2851_s6 = scalar_lea.vmem %s45_s21, 8192  ;;  %p2856_p6 = scmp.lt.s32.totalorder %s45_s21, %s45_s21 }
  0x2c   :  { %p2852_p5 = scmp.ne.s32.totalorder %s45_s21, %s2851_s6  ;;  %p2857_p7 = scmp.lt.s32.totalorder %s2851_s6, %s2851_s6 }
  0x2e   :  { %p2858_p8 = por %p2857_p7, %p2856_p6 }
  0x30   :  { %p2859_p9 = pnand %p2858_p8, %p2852_p5 }
  0x32   :  { %2862 = shalt.err (!%p2859_p9)
}
  0x33   :  { %50 = dma.hbm_to_vmem [thread:$0]  %s3877_s3, 8192, %s45_s21, [#allocation7], %s2895_s1, %s2895_s1, %s2896_s17  }
  0x34   :  { %2885 = dma.done.wait [#allocation4], 2048  }
  0x35   :  { %2886 = vsyncadd [#allocation4], 4294965248 }
  0x36   :  { %2887 = dma.done.wait [#allocation7], 16384  }
  0x37   :  { %2888 = vsyncadd [#allocation7], 4294950912  ;;  %v2453_v0 = vld [vmem:[#allocation6 + $0x4] ss:$16 sps:$4 sm:$0xff]   ;;  %v2455_v1 = vld [vmem:[#allocation6] ss:$16 sps:$4 sm:$0xff]  }
  0x38   :  { %600 = vmatprep.subr.bf16.mxu1 %v2453_v0  ;;  %v2456_v2 = vld [vmem:[#allocation6 + $0x24] ss:$16 sps:$4 sm:$0xff]   ;;  %v2458_v3 = vld [vmem:[#allocation6 + $0x20] ss:$16 sps:$4 sm:$0xff]   ;;  %v2506_v36 = vld [vmem:[#allocation6 + $0xc] ss:$16 sps:$4 sm:$0xff]  }
  0x39   :  { %601 = vmatpush1.bf16.msra.mxu1 %v2455_v1  ;;  %v2459_v4 = vld [vmem:[#allocation6 + $0x44] ss:$16 sps:$4 sm:$0xff]   ;;  %v2461_v5 = vld [vmem:[#allocation6 + $0x40] ss:$16 sps:$4 sm:$0xff]   ;;  %v2504_v38 = vld [vmem:[#allocation6 + $0x8] ss:$16 sps:$4 sm:$0xff]  }
  0x3a   :  { %602 = vmatprep.subr.bf16.mxu1 %v2456_v2  ;;  %v2462_v6 = vld [vmem:[#allocation6 + $0x64] ss:$16 sps:$4 sm:$0xff]   ;;  %v2464_v7 = vld [vmem:[#allocation6 + $0x60] ss:$16 sps:$4 sm:$0xff]   ;;  %v2509_v40 = vld [vmem:[#allocation6 + $0x2c] ss:$16 sps:$4 sm:$0xff]  }
  0x3b   :  { %v2465_v8 = vld [vmem:[#allocation6 + $0x84] ss:$16 sps:$4 sm:$0xff]   ;;  %v2467_v9 = vld [vmem:[#allocation6 + $0x80] ss:$16 sps:$4 sm:$0xff]   ;;  %v2507_v45 = vld [vmem:[#allocation6 + $0x28] ss:$16 sps:$4 sm:$0xff]  }
  0x3c   :  { %v2468_v10 = vld [vmem:[#allocation6 + $0xa4] ss:$16 sps:$4 sm:$0xff]   ;;  %v2470_v11 = vld [vmem:[#allocation6 + $0xa0] ss:$16 sps:$4 sm:$0xff]   ;;  %v2515_v46 = vld [vmem:[#allocation6 + $0x4c] ss:$16 sps:$4 sm:$0xff]  }
  0x3d   :  { %603 = vmatpush1.bf16.msra.mxu1 %v2458_v3  ;;  %v2471_v12 = vld [vmem:[#allocation6 + $0xc4] ss:$16 sps:$4 sm:$0xff]   ;;  %v2473_v14 = vld [vmem:[#allocation6 + $0xc0] ss:$16 sps:$4 sm:$0xff]   ;;  %v2513_v50 = vld [vmem:[#allocation6 + $0x48] ss:$16 sps:$4 sm:$0xff]  }
  0x3e   :  { %604 = vmatprep.subr.bf16.mxu1 %v2459_v4  ;;  %v2968_v13 = vld [vmem:[#allocation3 + $0x4] ss:$8 sps:$4 sm:$0xff]   ;;  %v2476_v16 = vld [vmem:[#allocation6 + $0xe0] ss:$16 sps:$4 sm:$0xff]   ;;  %v2576_v34 = vld [vmem:[#allocation8 + $0x14] ss:$8 sps:$4 sm:$0xff]  }
  0x3f   :  { %v2474_v15 = vld [vmem:[#allocation6 + $0xe4] ss:$16 sps:$4 sm:$0xff]   ;;  %632 = vmatprep.mubr.bf16.mxu1 %v2968_v13  ;;  %v2479_v18 = vld [vmem:[#allocation6 + $0x100] ss:$16 sps:$4 sm:$0xff]   ;;  %v2518_v52 = vld [vmem:[#allocation6 + $0x6c] ss:$16 sps:$4 sm:$0xff]  }
  0x40   :  { %v2477_v17 = vld [vmem:[#allocation6 + $0x104] ss:$16 sps:$4 sm:$0xff]   ;;  %v2482_v20 = vld [vmem:[#allocation6 + $0x120] ss:$16 sps:$4 sm:$0xff]   ;;  %v2516_v55 = vld [vmem:[#allocation6 + $0x68] ss:$16 sps:$4 sm:$0xff]  }
  0x41   :  { %605 = vmatpush1.bf16.msra.mxu1 %v2461_v5  ;;  %v2480_v19 = vld [vmem:[#allocation6 + $0x124] ss:$16 sps:$4 sm:$0xff]   ;;  %v2485_v22 = vld [vmem:[#allocation6 + $0x140] ss:$16 sps:$4 sm:$0xff]   ;;  %v2524_v56 = vld [vmem:[#allocation6 + $0x8c] ss:$16 sps:$4 sm:$0xff]  }
  0x42   :  { %606 = vmatprep.subr.bf16.mxu1 %v2462_v6  ;;  %v2483_v21 = vld [vmem:[#allocation6 + $0x144] ss:$16 sps:$4 sm:$0xff]   ;;  %v2488_v24 = vld [vmem:[#allocation6 + $0x160] ss:$16 sps:$4 sm:$0xff]   ;;  %v2522_v60 = vld [vmem:[#allocation6 + $0x88] ss:$16 sps:$4 sm:$0xff]  }
  0x43   :  { %v2486_v23 = vld [vmem:[#allocation6 + $0x164] ss:$16 sps:$4 sm:$0xff]   ;;  %v2491_v26 = vld [vmem:[#allocation6 + $0x180] ss:$16 sps:$4 sm:$0xff]   ;;  %v2527_v62 = vld [vmem:[#allocation6 + $0xac] ss:$16 sps:$4 sm:$0xff]  }
  0x44   :  { %v2489_v25 = vld [vmem:[#allocation6 + $0x184] ss:$16 sps:$4 sm:$0xff]   ;;  %v2494_v28 = vld [vmem:[#allocation6 + $0x1a0] ss:$16 sps:$4 sm:$0xff]   ;;  %v2525_v0 = vld [vmem:[#allocation6 + $0xa8] ss:$16 sps:$4 sm:$0xff]  }
  0x45   :  { %607 = vmatpush1.bf16.msra.mxu1 %v2464_v7  ;;  %v2492_v27 = vld [vmem:[#allocation6 + $0x1a4] ss:$16 sps:$4 sm:$0xff]   ;;  %v2497_v30 = vld [vmem:[#allocation6 + $0x1c0] ss:$16 sps:$4 sm:$0xff]   ;;  %v2533_v1 = vld [vmem:[#allocation6 + $0xcc] ss:$16 sps:$4 sm:$0xff]  }
  0x46   :  { %608 = vmatprep.subr.bf16.mxu1 %v2465_v8  ;;  %v2495_v29 = vld [vmem:[#allocation6 + $0x1c4] ss:$16 sps:$4 sm:$0xff]   ;;  %v2575_v33 = vld [vmem:[#allocation8] ss:$8 sps:$4 sm:$0xff]   ;;  %v2578_v39 = vld [vmem:[#allocation8 + $0x10] ss:$8 sps:$4 sm:$0xff]  }
  0x47   :  { %v2498_v31 = vld [vmem:[#allocation6 + $0x1e4] ss:$16 sps:$4 sm:$0xff]   ;;  %v2500_v35 = vld [vmem:[#allocation6 + $0x1e0] ss:$16 sps:$4 sm:$0xff]   ;;  %v2531_v3 = vld [vmem:[#allocation6 + $0xc8] ss:$16 sps:$4 sm:$0xff]  }
  0x48   :  { %v2573_v32 = vld [vmem:[#allocation8 + $0x4] ss:$8 sps:$4 sm:$0xff]   ;;  %v2971_v37 = vld [vmem:[#allocation3] ss:$8 sps:$4 sm:$0xff]   ;;  %v2973_v41 = vld [vmem:[#allocation3 + $0x14] ss:$8 sps:$4 sm:$0xff]  }
  0x49   :  { %609 = vmatpush1.bf16.msra.mxu1 %v2467_v9  ;;  %1850 = vmatprep.subr.bf16.mxu0 %v2573_v32  ;;  %v2579_v42 = vld [vmem:[#allocation8 + $0x24] ss:$8 sps:$4 sm:$0xff]   ;;  %v2581_v43 = vld [vmem:[#allocation8 + $0x20] ss:$8 sps:$4 sm:$0xff]   ;;  %v2582_v44 = vld [vmem:[#allocation8 + $0x34] ss:$8 sps:$4 sm:$0xff]  }
  0x4a   :  { %610 = vmatprep.subr.bf16.mxu1 %v2468_v10  ;;  %1851 = vmatpush1.bf16.msra.mxu0 %v2575_v33  ;;  %v2584_v47 = vld [vmem:[#allocation8 + $0x30] ss:$8 sps:$4 sm:$0xff]   ;;  %v2585_v49 = vld [vmem:[#allocation8 + $0x44] ss:$8 sps:$4 sm:$0xff]   ;;  %v2587_v53 = vld [vmem:[#allocation8 + $0x40] ss:$8 sps:$4 sm:$0xff]  }
  0x4b   :  { %1852 = vmatprep.subr.bf16.mxu0 %v2576_v34  ;;  %v2977_v48 = vld [vmem:[#allocation3 + $0x10] ss:$8 sps:$4 sm:$0xff]   ;;  %v2979_v51 = vld [vmem:[#allocation3 + $0x24] ss:$8 sps:$4 sm:$0xff]   ;;  %v2588_v54 = vld [vmem:[#allocation8 + $0x54] ss:$8 sps:$4 sm:$0xff]  }
  0x4c   :  { %v2590_v57 = vld [vmem:[#allocation8 + $0x50] ss:$8 sps:$4 sm:$0xff]   ;;  %v2983_v58 = vld [vmem:[#allocation3 + $0x20] ss:$8 sps:$4 sm:$0xff]   ;;  %v2591_v59 = vld [vmem:[#allocation8 + $0x64] ss:$8 sps:$4 sm:$0xff]  }
  0x4d   :  { %611 = vmatpush1.bf16.msra.mxu1 %v2470_v11  ;;  %v2985_v61 = vld [vmem:[#allocation3 + $0x34] ss:$8 sps:$4 sm:$0xff]   ;;  %v2593_v63 = vld [vmem:[#allocation8 + $0x60] ss:$8 sps:$4 sm:$0xff]   ;;  %v2989_v2 = vld [vmem:[#allocation3 + $0x30] ss:$8 sps:$4 sm:$0xff]  }
  0x4e   :  { %612 = vmatprep.subr.bf16.mxu1 %v2471_v12  ;;  %1853 = vmatpush1.bf16.msra.mxu0 %v2578_v39  ;;  %v2991_v4 = vld [vmem:[#allocation3 + $0x44] ss:$8 sps:$4 sm:$0xff]   ;;  %v2534_v6 = vld [vmem:[#allocation6 + $0xe8] ss:$16 sps:$4 sm:$0xff]   ;;  %v2997_v10 = vld [vmem:[#allocation3 + $0x54] ss:$8 sps:$4 sm:$0xff]  }
  0x4f   :  { %1854 = vmatprep.subr.bf16.mxu0 %v2579_v42  ;;  %v2536_v5 = vld [vmem:[#allocation6 + $0xec] ss:$16 sps:$4 sm:$0xff]   ;;  %v2995_v8 = vld [vmem:[#allocation3 + $0x40] ss:$8 sps:$4 sm:$0xff]   ;;  %v2596_v32 = vld [vmem:[#allocation8 + $0x70] ss:$8 sps:$4 sm:$0xff]  }
  0x50   :  { %v2542_v7 = vld [vmem:[#allocation6 + $0x10c] ss:$16 sps:$4 sm:$0xff]   ;;  %v2540_v9 = vld [vmem:[#allocation6 + $0x108] ss:$16 sps:$4 sm:$0xff]  }
  0x51   :  { %613 = vmatpush1.bf16.msra.mxu1 %v2473_v14  ;;  %v2545_v11 = vld [vmem:[#allocation6 + $0x12c] ss:$16 sps:$4 sm:$0xff]   ;;  %v2543_v12 = vld [vmem:[#allocation6 + $0x128] ss:$16 sps:$4 sm:$0xff]  }
  0x52   :  { %614 = vmatprep.subr.bf16.mxu1 %v2474_v15  ;;  %1855 = vmatpush1.bf16.msra.mxu0 %v2581_v43  ;;  %v2551_v14 = vld [vmem:[#allocation6 + $0x14c] ss:$16 sps:$4 sm:$0xff]   ;;  %v3001_v15 = vld [vmem:[#allocation3 + $0x50] ss:$8 sps:$4 sm:$0xff]  }
  0x53   :  { %1856 = vmatprep.subr.bf16.mxu0 %v2582_v44  ;;  %v2597_v33 = vld [vmem:[#allocation8 + $0x84] ss:$8 sps:$4 sm:$0xff]   ;;  %v2600_v34 = vld [vmem:[#allocation8 + $0x94] ss:$8 sps:$4 sm:$0xff]   ;;  %v2608_v39 = vld [vmem:[#allocation8 + $0xb0] ss:$8 sps:$4 sm:$0xff]  }
  0x54   :  { %v2612_v42 = vld [vmem:[#allocation8 + $0xd4] ss:$8 sps:$4 sm:$0xff]   ;;  %v2614_v43 = vld [vmem:[#allocation8 + $0xd0] ss:$8 sps:$4 sm:$0xff]   ;;  %v2615_v44 = vld [vmem:[#allocation8 + $0xe4] ss:$8 sps:$4 sm:$0xff]  }
  0x55   :  { %615 = vmatpush1.bf16.msra.mxu1 %v2476_v16  ;;  %v2549_v16 = vld [vmem:[#allocation6 + $0x148] ss:$16 sps:$4 sm:$0xff]  }
  0x56   :  { %616 = vmatprep.subr.bf16.mxu1 %v2477_v17  ;;  %1857 = vmatpush1.bf16.msra.mxu0 %v2584_v47  ;;  %v3003_v17 = vld [vmem:[#allocation3 + $0x64] ss:$8 sps:$4 sm:$0xff]   ;;  %v2620_v47 = vld [vmem:[#allocation8 + $0xf0] ss:$8 sps:$4 sm:$0xff]  }
  0x57   :  { %1858 = vmatprep.subr.bf16.mxu0 %v2585_v49  ;;  %v180_v49 = vlaneseq }
  0x59   :  { %617 = vmatpush1.bf16.msra.mxu1 %v2479_v18  ;;  %v2554_v18 = vld [vmem:[#allocation6 + $0x16c] ss:$16 sps:$4 sm:$0xff]  }
  0x5a   :  { %618 = vmatprep.subr.bf16.mxu1 %v2480_v19  ;;  %1859 = vmatpush1.bf16.msra.mxu0 %v2587_v53  ;;  %v2552_v19 = vld [vmem:[#allocation6 + $0x168] ss:$16 sps:$4 sm:$0xff]  }
  0x5b   :  { %1860 = vmatprep.subr.bf16.mxu0 %v2588_v54 }
  0x5d   :  { %619 = vmatpush1.bf16.msra.mxu1 %v2482_v20  ;;  %v2560_v20 = vld [vmem:[#allocation6 + $0x18c] ss:$16 sps:$4 sm:$0xff]  }
  0x5e   :  { %620 = vmatprep.subr.bf16.mxu1 %v2483_v21  ;;  %1861 = vmatpush1.bf16.msra.mxu0 %v2590_v57  ;;  %v3007_v21 = vld [vmem:[#allocation3 + $0x60] ss:$8 sps:$4 sm:$0xff]  }
  0x5f   :  { %1862 = vmatprep.subr.bf16.mxu0 %v2591_v59 }
  0x61   :  { %621 = vmatpush1.bf16.msra.mxu1 %v2485_v22  ;;  %v2558_v22 = vld [vmem:[#allocation6 + $0x188] ss:$16 sps:$4 sm:$0xff]  }
  0x62   :  { %622 = vmatprep.subr.bf16.mxu1 %v2486_v23  ;;  %1863 = vmatpush1.bf16.msra.mxu0 %v2593_v63  ;;  %v3009_v23 = vld [vmem:[#allocation3 + $0x74] ss:$8 sps:$4 sm:$0xff]  }
  0x65   :  { %623 = vmatpush1.bf16.msra.mxu1 %v2488_v24  ;;  %v2563_v24 = vld [vmem:[#allocation6 + $0x1ac] ss:$16 sps:$4 sm:$0xff]  }
  0x66   :  { %624 = vmatprep.subr.bf16.mxu1 %v2489_v25  ;;  %v2561_v25 = vld [vmem:[#allocation6 + $0x1a8] ss:$16 sps:$4 sm:$0xff]  }
  0x69   :  { %625 = vmatpush1.bf16.msra.mxu1 %v2491_v26  ;;  %v2569_v26 = vld [vmem:[#allocation6 + $0x1cc] ss:$16 sps:$4 sm:$0xff]  }
  0x6a   :  { %626 = vmatprep.subr.bf16.mxu1 %v2492_v27  ;;  %v2566_v27 = vld [vmem:[#allocation3 + $0x70] ss:$8 sps:$4 sm:$0xff]  }
  0x6d   :  { %627 = vmatpush1.bf16.msra.mxu1 %v2494_v28  ;;  %v2567_v28 = vld [vmem:[#allocation6 + $0x1c8] ss:$16 sps:$4 sm:$0xff]  }
  0x6e   :  { %628 = vmatprep.subr.bf16.mxu1 %v2495_v29  ;;  %v2572_v29 = vld [vmem:[#allocation6 + $0x1ec] ss:$16 sps:$4 sm:$0xff]  }
  0x71   :  { %629 = vmatpush1.bf16.msra.mxu1 %v2497_v30  ;;  %v2570_v30 = vld [vmem:[#allocation6 + $0x1e8] ss:$16 sps:$4 sm:$0xff]  }
  0x72   :  { %630 = vmatprep.subr.bf16.mxu1 %v2498_v31  ;;  %v2594_v31 = vld [vmem:[#allocation8 + $0x74] ss:$8 sps:$4 sm:$0xff]  }
  0x73   :  { %1864 = vmatprep.subr.bf16.mxu0 %v2594_v31 }
  0x74   :  { %1865 = vmatpush1.bf16.msra.mxu0 %v2596_v32 }
  0x75   :  { %631 = vmatpush1.bf16.msra.mxu1 %v2500_v35  ;;  %1866 = vmatprep.subr.bf16.mxu0 %v2597_v33  ;;  %v2602_v35 = vld [vmem:[#allocation8 + $0x90] ss:$8 sps:$4 sm:$0xff]  }
  0x76   :  { %713 = vmatprep.subr.bf16.mxu1 %v2506_v36  ;;  %v2603_v36 = vld [vmem:[#allocation8 + $0xa4] ss:$8 sps:$4 sm:$0xff]  }
  0x78   :  { %633 = vmatmul.mubr.bf16.vlgmr.msra.gmra.mrb[0].mxu1 %v2971_v37 }
  0x79   :  { %714 = vmatpush1.bf16.msra.mxu1 %v2504_v38  ;;  %642 = vmatprep.mubr.bf16.mxu1 %v2973_v41  ;;  %v2606_v38 = vld [vmem:[#allocation8 + $0xb4] ss:$8 sps:$4 sm:$0xff]  }
  0x7a   :  { %715 = vmatprep.subr.bf16.mxu1 %v2509_v40  ;;  %v2609_v40 = vld [vmem:[#allocation8 + $0xc4] ss:$8 sps:$4 sm:$0xff]  }
  0x7d   :  { %716 = vmatpush1.bf16.msra.mxu1 %v2507_v45  ;;  %v2617_v45 = vld [vmem:[#allocation8 + $0xe0] ss:$8 sps:$4 sm:$0xff]  }
  0x7e   :  { %717 = vmatprep.subr.bf16.mxu1 %v2515_v46  ;;  %v2618_v46 = vld [vmem:[#allocation8 + $0xf4] ss:$8 sps:$4 sm:$0xff]  }
  0x80   :  { %643 = vmatmul.mubr.bf16.gmra.mrb[4].mxu1 %v2977_v48 }
  0x81   :  { %718 = vmatpush1.bf16.msra.mxu1 %v2513_v50  ;;  %652 = vmatprep.mubr.bf16.mxu1 %v2979_v51  ;;  %v3028_v50 = vshrl.u32 %v180_v49, 7 }
  0x82   :  { %719 = vmatprep.subr.bf16.mxu1 %v2518_v52  ;;  %v3034_v52 = vld [vmem:[%s3876_s2] sm:$0xf] }
  0x83   :  { %v186_v53 = vsub.s32 1, %v3028_v50 }
  0x85   :  { %720 = vmatpush1.bf16.msra.mxu1 %v2516_v55  ;;  %v3045_v55 = vrot.slane %v3034_v52, %v186_v53 }
  0x86   :  { %721 = vmatprep.subr.bf16.mxu1 %v2524_v56 }
  0x88   :  { %653 = vmatmul.mubr.bf16.gmra.mrb[8].mxu1 %v2983_v58 }
  0x89   :  { %722 = vmatpush1.bf16.msra.mxu1 %v2522_v60  ;;  %662 = vmatprep.mubr.bf16.mxu1 %v2985_v61 }
  0x8a   :  { %723 = vmatprep.subr.bf16.mxu1 %v2527_v62 }
  0x8d   :  { %724 = vmatpush1.bf16.msra.mxu1 %v2525_v0 }
  0x8e   :  { %725 = vmatprep.subr.bf16.mxu1 %v2533_v1 }
  0x90   :  { %663 = vmatmul.mubr.bf16.gmra.mrb[12].mxu1 %v2989_v2 }
  0x91   :  { %726 = vmatpush1.bf16.msra.mxu1 %v2531_v3  ;;  %672 = vmatprep.mubr.bf16.mxu1 %v2991_v4 }
  0x92   :  { %727 = vmatprep.subr.bf16.mxu1 %v2536_v5 }
  0x95   :  { %728 = vmatpush1.bf16.msra.mxu1 %v2534_v6 }
  0x96   :  { %729 = vmatprep.subr.bf16.mxu1 %v2542_v7 }
  0x98   :  { %673 = vmatmul.mubr.bf16.gmra.mrb[16].mxu1 %v2995_v8 }
  0x99   :  { %730 = vmatpush1.bf16.msra.mxu1 %v2540_v9  ;;  %682 = vmatprep.mubr.bf16.mxu1 %v2997_v10 }
  0x9a   :  { %731 = vmatprep.subr.bf16.mxu1 %v2545_v11 }
  0x9d   :  { %732 = vmatpush1.bf16.msra.mxu1 %v2543_v12 }
  0x9e   :  { %733 = vmatprep.subr.bf16.mxu1 %v2551_v14 }
  0xa0   :  { %683 = vmatmul.mubr.bf16.gmra.mrb[20].mxu1 %v3001_v15 }
  0xa1   :  { %734 = vmatpush1.bf16.msra.mxu1 %v2549_v16  ;;  %692 = vmatprep.mubr.bf16.mxu1 %v3003_v17 }
  0xa2   :  { %735 = vmatprep.subr.bf16.mxu1 %v2554_v18 }
  0xa5   :  { %736 = vmatpush1.bf16.msra.mxu1 %v2552_v19 }
  0xa6   :  { %737 = vmatprep.subr.bf16.mxu1 %v2560_v20  ;;  %v190_v20 = vsub.s32 2, %v3028_v50 }
  0xa8   :  { %693 = vmatmul.mubr.bf16.gmra.mrb[24].mxu1 %v3007_v21 }
  0xa9   :  { %738 = vmatpush1.bf16.msra.mxu1 %v2558_v22  ;;  %702 = vmatprep.mubr.bf16.mxu1 %v3009_v23 }
  0xaa   :  { %739 = vmatprep.subr.bf16.mxu1 %v2563_v24 }
  0xad   :  { %740 = vmatpush1.bf16.msra.mxu1 %v2561_v25 }
  0xae   :  { %741 = vmatprep.subr.bf16.mxu1 %v2569_v26 }
  0xb0   :  { %703 = vmatmul.mubr.bf16.gmra.mrb[28].mxu1 %v2566_v27 }
  0xb1   :  { %742 = vmatpush1.bf16.msra.mxu1 %v2567_v28  ;;  %745 = vmatprep.mubr.bf16.mxu1 %v2968_v13  ;;  %v2599_v13 = vld [vmem:[#allocation8 + $0x80] ss:$8 sps:$4 sm:$0xff]  }
  0xb2   :  { %743 = vmatprep.subr.bf16.mxu1 %v2572_v29  ;;  %1867 = vmatpush1.bf16.msra.mxu0 %v2599_v13 }
  0xb3   :  { %1868 = vmatprep.subr.bf16.mxu0 %v2600_v34 }
  0xb5   :  { %744 = vmatpush1.bf16.msra.mxu1 %v2570_v30 }
  0xb6   :  { %1869 = vmatpush1.bf16.msra.mxu0 %v2602_v35 }
  0xb7   :  { %1870 = vmatprep.subr.bf16.mxu0 %v2603_v36 }
  0xb8   :  { %746 = vmatmul.mubr.bf16.vlgmr.msra.gmra.mrb[32].mxu1 %v2971_v37  ;;  %v2605_v37 = vld [vmem:[#allocation8 + $0xa0] ss:$8 sps:$4 sm:$0xff]  }
  0xb9   :  { %755 = vmatprep.mubr.bf16.mxu1 %v2973_v41  ;;  %v2611_v41 = vld [vmem:[#allocation8 + $0xc0] ss:$8 sps:$4 sm:$0xff]  }
  0xba   :  { %1871 = vmatpush1.bf16.msra.mxu0 %v2605_v37 }
  0xbb   :  { %1872 = vmatprep.subr.bf16.mxu0 %v2606_v38 }
  0xbe   :  { %1873 = vmatpush1.bf16.msra.mxu0 %v2608_v39 }
  0xbf   :  { %1874 = vmatprep.subr.bf16.mxu0 %v2609_v40  ;;  %v3101_v40 = vrot.slane %v3034_v52, %v190_v20 }
  0xc0   :  { %756 = vmatmul.mubr.bf16.gmra.mrb[36].mxu1 %v2977_v48  ;;  %v2623_v48 = vld [vmem:[#allocation8 + $0x104] ss:$8 sps:$4 sm:$0xff]  }
  0xc1   :  { %765 = vmatprep.mubr.bf16.mxu1 %v2979_v51  ;;  %v182_v51 = vsub.s32 0, %v3028_v50 }
  0xc2   :  { %1875 = vmatpush1.bf16.msra.mxu0 %v2611_v41 }
  0xc3   :  { %1876 = vmatprep.subr.bf16.mxu0 %v2612_v42  ;;  %v3040_v54 = vrot.slane %v3034_v52, %v182_v51 }
  0xc6   :  { %1877 = vmatpush1.bf16.msra.mxu0 %v2614_v43 }
  0xc7   :  { %1878 = vmatprep.subr.bf16.mxu0 %v2615_v44 }
  0xc8   :  { %766 = vmatmul.mubr.bf16.gmra.mrb[40].mxu1 %v2983_v58 }
  0xc9   :  { %775 = vmatprep.mubr.bf16.mxu1 %v2985_v61 }
  0xca   :  { %1879 = vmatpush1.bf16.msra.mxu0 %v2617_v45  ;;  %v194_v45 = vsub.s32 3, %v3028_v50 }
  0xcb   :  { %1880 = vmatprep.subr.bf16.mxu0 %v2618_v46 }
  0xce   :  { %1881 = vmatpush1.bf16.msra.mxu0 %v2620_v47 }
  0xcf   :  { %1963 = vmatprep.subr.bf16.mxu0 %v2623_v48 }
  0xd0   :  { %776 = vmatmul.mubr.bf16.gmra.mrb[44].mxu1 %v2989_v2 }
  0xd1   :  { %785 = vmatprep.mubr.bf16.mxu1 %v2991_v4 }
  0xd8   :  { %786 = vmatmul.mubr.bf16.gmra.mrb[48].mxu1 %v2995_v8 }
  0xd9   :  { %795 = vmatprep.mubr.bf16.mxu1 %v2997_v10 }
  0xe0   :  { %796 = vmatmul.mubr.bf16.gmra.mrb[52].mxu1 %v3001_v15 }
  0xe1   :  { %805 = vmatprep.mubr.bf16.mxu1 %v3003_v17 }
  0xe8   :  { %806 = vmatmul.mubr.bf16.gmra.mrb[56].mxu1 %v3007_v21 }
  0xe9   :  { %815 = vmatprep.mubr.bf16.mxu1 %v3009_v23 }
  0xf0   :  { %816 = vmatmul.mubr.bf16.gmra.mrb[60].mxu1 %v2566_v27 }
 0x14b   :  { %v634_v56 = vpop.f32.mrb[0].mxu1 }
 0x14c   :  { %v3048_v57 = vadd.f32 %v634_v56, %v3040_v54  ;;  %v636_v58 = vpop.f32.mrb[1].mxu1 }
 0x14d   :  { %v3051_v59 = vadd.f32 %v636_v58, %v3045_v55  ;;  %v638_v60 = vpop.f32.mrb[2].mxu1 }
 0x14e   :  { %v826_v61 = vmul.f32 %v3048_v57, %v3048_v57  ;;  %v3056_v62 = vadd.f32 %v638_v60, %v3040_v54  ;;  %v640_v63 = vpop.f32.mrb[3].mxu1 }
 0x14f   :  { %v827_v0 = vmul.f32 %v3051_v59, %v3051_v59  ;;  %v3061_v1 = vadd.f32 %v640_v63, %v3045_v55 }
 0x150   :  { %v890_v2 = vmul.f32 %v826_v61, %v3048_v57  ;;  %v830_v3 = vmul.f32 %v3056_v62, %v3056_v62 }
 0x151   :  { %v891_v4 = vmul.f32 %v827_v0, %v3051_v59  ;;  %v831_v5 = vmul.f32 %v3061_v1, %v3061_v1 }
 0x152   :  { %v954_v6 = vmul.f32 0.044715, %v890_v2  ;;  %v894_v7 = vmul.f32 %v830_v3, %v3056_v62 }
 0x153   :  { %v955_v8 = vmul.f32 0.044715, %v891_v4  ;;  %v895_v9 = vmul.f32 %v831_v5, %v3061_v1  ;;  %v644_v10 = vpop.f32.mrb[4].mxu1 }
 0x154   :  { %v1018_v11 = vadd.f32 %v954_v6, %v3048_v57  ;;  %v958_v12 = vmul.f32 0.044715, %v894_v7  ;;  %v3073_v14 = vadd.f32 %v644_v10, %v3040_v54  ;;  %v646_v15 = vpop.f32.mrb[5].mxu1 }
 0x155   :  { %v959_v16 = vmul.f32 0.044715, %v895_v9  ;;  %v3076_v17 = vadd.f32 %v646_v15, %v3045_v55  ;;  %v648_v18 = vpop.f32.mrb[6].mxu1  ;;  %v1019_v19 = vadd.f32 %v955_v8, %v3051_v59 }
 0x156   :  { %v1082_v21 = vmul.f32 0.7978846, %v1018_v11  ;;  %v1022_v22 = vadd.f32 %v958_v12, %v3056_v62  ;;  %v834_v23 = vmul.f32 %v3073_v14, %v3073_v14  ;;  %v3084_v24 = vadd.f32 %v648_v18, %v3040_v54  ;;  %v650_v25 = vpop.f32.mrb[7].mxu1 }
 0x157   :  { %v835_v26 = vmul.f32 %v3076_v17, %v3076_v17  ;;  %v3089_v27 = vadd.f32 %v650_v25, %v3045_v55  ;;  %v1023_v28 = vadd.f32 %v959_v16, %v3061_v1  ;;  %v1083_v29 = vmul.f32 0.7978846, %v1019_v19 }
 0x158   :  { %2669 = vtanh.f32 %v1082_v21  ;;  %v1086_v30 = vmul.f32 0.7978846, %v1022_v22  ;;  %v898_v31 = vmul.f32 %v834_v23, %v3073_v14  ;;  %v838_v32 = vmul.f32 %v3084_v24, %v3084_v24 }
 0x159   :  { %v899_v33 = vmul.f32 %v835_v26, %v3076_v17  ;;  %v839_v13 = vmul.f32 %v3089_v27, %v3089_v27  ;;  %v1087_v34 = vmul.f32 0.7978846, %v1023_v28  ;;  %2671 = vtanh.f32 %v1083_v29 }
 0x15a   :  { %2673 = vtanh.f32 %v1086_v30  ;;  %v962_v35 = vmul.f32 0.044715, %v898_v31  ;;  %v902_v36 = vmul.f32 %v838_v32, %v3084_v24  ;;  %v3132_v16 = vrot.slane %v3034_v52, %v194_v45 }
 0x15b   :  { %v963_v37 = vmul.f32 0.044715, %v899_v33  ;;  %v903_v38 = vmul.f32 %v839_v13, %v3089_v27  ;;  %v654_v39 = vpop.f32.mrb[8].mxu1  ;;  %2675 = vtanh.f32 %v1087_v34 }
 0x15c   :  { %v1026_v41 = vadd.f32 %v962_v35, %v3073_v14  ;;  %v966_v42 = vmul.f32 0.044715, %v902_v36  ;;  %v3105_v43 = vadd.f32 %v654_v39, %v3040_v54  ;;  %v656_v44 = vpop.f32.mrb[9].mxu1 }
 0x15d   :  { %v1027_v46 = vadd.f32 %v963_v37, %v3076_v17  ;;  %v967_v47 = vmul.f32 0.044715, %v903_v38  ;;  %v3110_v48 = vadd.f32 %v656_v44, %v3045_v55  ;;  %v658_v49 = vpop.f32.mrb[10].mxu1 }
 0x15e   :  { %v1090_v56 = vmul.f32 0.7978846, %v1026_v41  ;;  %v1030_v58 = vadd.f32 %v966_v42, %v3084_v24  ;;  %v842_v60 = vmul.f32 %v3105_v43, %v3105_v43  ;;  %v3116_v61 = vadd.f32 %v658_v49, %v3040_v54  ;;  %v660_v63 = vpop.f32.mrb[11].mxu1 }
 0x15f   :  { %v1091_v0 = vmul.f32 0.7978846, %v1027_v46  ;;  %v1031_v2 = vadd.f32 %v967_v47, %v3089_v27  ;;  %v843_v3 = vmul.f32 %v3110_v48, %v3110_v48  ;;  %v3122_v4 = vadd.f32 %v660_v63, %v3045_v55 }
 0x160   :  { %2677 = vtanh.f32 %v1090_v56  ;;  %v1094_v5 = vmul.f32 0.7978846, %v1030_v58  ;;  %v906_v6 = vmul.f32 %v842_v60, %v3105_v43  ;;  %v846_v7 = vmul.f32 %v3116_v61, %v3116_v61 }
 0x161   :  { %2679 = vtanh.f32 %v1091_v0  ;;  %v1095_v8 = vmul.f32 0.7978846, %v1031_v2  ;;  %v907_v9 = vmul.f32 %v843_v3, %v3110_v48  ;;  %v847_v10 = vmul.f32 %v3122_v4, %v3122_v4 }
 0x162   :  { %v2670_v11 = vpop.eup %2669  ;;  %2681 = vtanh.f32 %v1094_v5  ;;  %v970_v12 = vmul.f32 0.044715, %v906_v6  ;;  %v910_v15 = vmul.f32 %v846_v7, %v3116_v61 }
 0x163   :  { %v2672_v18 = vpop.eup %2671  ;;  %2683 = vtanh.f32 %v1095_v8  ;;  %v971_v19 = vmul.f32 0.044715, %v907_v9  ;;  %v911_v20 = vmul.f32 %v847_v10, %v3122_v4  ;;  %v664_v21 = vpop.f32.mrb[12].mxu1  ;;  %v3135_v22 = vadd.f32 1.0, %v2670_v11 }
 0x164   :  { %v2674_v23 = vpop.eup %2673  ;;  %v1034_v25 = vadd.f32 %v970_v12, %v3105_v43  ;;  %v974_v26 = vmul.f32 0.044715, %v910_v15  ;;  %v3139_v28 = vadd.f32 %v664_v21, %v3040_v54  ;;  %v666_v29 = vpop.f32.mrb[13].mxu1  ;;  %v1211_v30 = vadd.f32 1.0, %v2672_v18 }
 0x165   :  { %v1035_v52 = vadd.f32 %v971_v19, %v3110_v48  ;;  %v975_v31 = vmul.f32 0.044715, %v911_v20  ;;  %v3143_v32 = vadd.f32 %v666_v29, %v3045_v55  ;;  %v668_v33 = vpop.f32.mrb[14].mxu1  ;;  %v3145_v13 = vadd.f32 1.0, %v2674_v23  ;;  %v2676_v39 = vpop.eup %2675 }
 0x166   :  { %v1098_v34 = vmul.f32 0.7978846, %v1034_v25  ;;  %v1038_v35 = vadd.f32 %v974_v26, %v3116_v61  ;;  %v850_v36 = vmul.f32 %v3139_v28, %v3139_v28  ;;  %v3151_v37 = vadd.f32 %v668_v33, %v3040_v54  ;;  %v670_v38 = vpop.f32.mrb[15].mxu1 }
 0x167   :  { %v1099_v41 = vmul.f32 0.7978846, %v1035_v52  ;;  %v1039_v42 = vadd.f32 %v975_v31, %v3122_v4  ;;  %v851_v44 = vmul.f32 %v3143_v32, %v3143_v32  ;;  %v3157_v45 = vadd.f32 %v670_v38, %v3045_v55 }
 0x168   :  { %2685 = vtanh.f32 %v1098_v34  ;;  %v1102_v46 = vmul.f32 0.7978846, %v1038_v35  ;;  %v914_v47 = vmul.f32 %v850_v36, %v3139_v28  ;;  %v854_v49 = vmul.f32 %v3151_v37, %v3151_v37 }
 0x169   :  { %2687 = vtanh.f32 %v1099_v41  ;;  %v1103_v56 = vmul.f32 0.7978846, %v1039_v42  ;;  %v915_v58 = vmul.f32 %v851_v44, %v3143_v32  ;;  %v855_v60 = vmul.f32 %v3157_v45, %v3157_v45 }
 0x16a   :  { %v3165_v63 = vpop.eup %2677  ;;  %2689 = vtanh.f32 %v1102_v46  ;;  %v978_v0 = vmul.f32 0.044715, %v914_v47  ;;  %v918_v2 = vmul.f32 %v854_v49, %v3151_v37  ;;  %v1215_v3 = vadd.f32 1.0, %v2676_v39 }
 0x16b   :  { %v3168_v5 = vpop.eup %2679  ;;  %2691 = vtanh.f32 %v1103_v56  ;;  %v979_v6 = vmul.f32 0.044715, %v915_v58  ;;  %v919_v7 = vmul.f32 %v855_v60, %v3157_v45  ;;  %v674_v8 = vpop.f32.mrb[16].mxu1  ;;  %v1275_v9 = vmul.f32 0.5, %v1211_v30 }
 0x16c   :  { %v3171_v10 = vpop.eup %2681  ;;  %v1042_v11 = vadd.f32 %v978_v0, %v3139_v28  ;;  %v982_v12 = vmul.f32 0.044715, %v918_v2  ;;  %v3175_v15 = vadd.f32 %v674_v8, %v3040_v54  ;;  %v676_v18 = vpop.f32.mrb[17].mxu1  ;;  %v1279_v19 = vmul.f32 0.5, %v1215_v3 }
 0x16d   :  { %v3177_v20 = vpop.eup %2683  ;;  %v1043_v21 = vadd.f32 %v979_v6, %v3143_v32  ;;  %v983_v23 = vmul.f32 0.044715, %v919_v7  ;;  %v3181_v25 = vadd.f32 %v676_v18, %v3045_v55  ;;  %v678_v26 = vpop.f32.mrb[18].mxu1  ;;  %v1339_v29 = vmul.f32 %v1275_v9, %v3051_v59 }
 0x16e   :  { %v1106_v30 = vmul.f32 0.7978846, %v1042_v11  ;;  %v1046_v52 = vadd.f32 %v982_v12, %v3151_v37  ;;  %v858_v31 = vmul.f32 %v3175_v15, %v3175_v15  ;;  %v3188_v33 = vadd.f32 %v678_v26, %v3040_v54  ;;  %v680_v34 = vpop.f32.mrb[19].mxu1 }
 0x16f   :  { %v1107_v35 = vmul.f32 0.7978846, %v1043_v21  ;;  %v1047_v36 = vadd.f32 %v983_v23, %v3157_v45  ;;  %v859_v38 = vmul.f32 %v3181_v25, %v3181_v25  ;;  %v3194_v39 = vadd.f32 %v680_v34, %v3045_v55 }
 0x170   :  { %2693 = vtanh.f32 %v1106_v30  ;;  %v1110_v59 = vmul.f32 0.7978846, %v1046_v52  ;;  %v922_v41 = vmul.f32 %v858_v31, %v3175_v15  ;;  %v862_v42 = vmul.f32 %v3188_v33, %v3188_v33 }
 0x171   :  { %2695 = vtanh.f32 %v1107_v35  ;;  %v1111_v44 = vmul.f32 0.7978846, %v1047_v36  ;;  %v923_v46 = vmul.f32 %v859_v38, %v3181_v25  ;;  %v863_v47 = vmul.f32 %v3194_v39, %v3194_v39  ;;  %v2621_v38 = vld [vmem:[#allocation8 + $0x100] ss:$8 sps:$4 sm:$0xff]  }
 0x172   :  { %v3202_v49 = vpop.eup %2685  ;;  %2697 = vtanh.f32 %v1110_v59  ;;  %v986_v56 = vmul.f32 0.044715, %v922_v41  ;;  %v926_v58 = vmul.f32 %v862_v42, %v3188_v33  ;;  %v1343_v60 = vmul.f32 %v1279_v19, %v3061_v1 }
 0x173   :  { %v3206_v0 = vpop.eup %2687  ;;  %2699 = vtanh.f32 %v1111_v44  ;;  %v987_v2 = vmul.f32 0.044715, %v923_v46  ;;  %v927_v3 = vmul.f32 %v863_v47, %v3194_v39  ;;  %v1274_v6 = vmul.f32 0.5, %v3135_v22  ;;  %v684_v7 = vpop.f32.mrb[20].mxu1  ;;  %v2626_v44 = vld [vmem:[#allocation8 + $0x114] ss:$8 sps:$4 sm:$0xff]  }
 0x174   :  { %v3210_v8 = vpop.eup %2689  ;;  %v1050_v9 = vadd.f32 %v986_v56, %v3175_v15  ;;  %v990_v11 = vmul.f32 0.044715, %v926_v58  ;;  %v1435_v12 = vpack.c.bf16 %v1343_v60, %v1339_v29  ;;  %v1278_v18 = vmul.f32 0.5, %v3145_v13  ;;  %v686_v21 = vpop.f32.mrb[21].mxu1  ;;  %v2624_v60 = vld [vmem:[#allocation8 + $0x110] ss:$8 sps:$4 sm:$0xff]  }
 0x175   :  { %v3214_v23 = vpop.eup %2691  ;;  %v1051_v1 = vadd.f32 %v987_v2, %v3181_v25  ;;  %v991_v19 = vmul.f32 0.044715, %v927_v3  ;;  %v1338_v26 = vmul.f32 %v1274_v6, %v3048_v57  ;;  %v3219_v30 = vadd.f32 %v684_v7, %v3040_v54  ;;  %v688_v22 = vpop.f32.mrb[22].mxu1 }
 0x176   :  { %v1114_v52 = vmul.f32 0.7978846, %v1050_v9  ;;  %v1054_v31 = vadd.f32 %v990_v11, %v3188_v33  ;;  %1882 = vmatprep.mubr.bf16.mxu0 %v1435_v12  ;;  %v1342_v29 = vmul.f32 %v1278_v18, %v3056_v62  ;;  %v3224_v13 = vadd.f32 %v686_v21, %v3045_v55  ;;  %v690_v34 = vpop.f32.mrb[23].mxu1  ;;  %v2629_v18 = vld [vmem:[#allocation8 + $0x124] ss:$8 sps:$4 sm:$0xff]  }
 0x177   :  { %v1115_v35 = vmul.f32 0.7978846, %v1051_v1  ;;  %v1055_v36 = vadd.f32 %v991_v19, %v3194_v39  ;;  %v866_v57 = vmul.f32 %v3219_v30, %v3219_v30  ;;  %v3230_v59 = vadd.f32 %v688_v22, %v3040_v54 }
 0x178   :  { %2701 = vtanh.f32 %v1114_v52  ;;  %v1118_v41 = vmul.f32 0.7978846, %v1054_v31  ;;  %v1434_v42 = vpack.c.bf16 %v1342_v29, %v1338_v26  ;;  %v867_v62 = vmul.f32 %v3224_v13, %v3224_v13 }
 0x179   :  { %2703 = vtanh.f32 %v1115_v35  ;;  %v1119_v46 = vmul.f32 0.7978846, %v1055_v36  ;;  %v930_v47 = vmul.f32 %v866_v57, %v3219_v30  ;;  %v870_v56 = vmul.f32 %v3230_v59, %v3230_v59 }
 0x17a   :  { %v3237_v58 = vpop.eup %2693  ;;  %2705 = vtanh.f32 %v1118_v41  ;;  %1883 = vmatmul.mubr.bf16.vlgmr.msra.gmra.mrb[0].mxu0 %v1434_v42  ;;  %v931_v2 = vmul.f32 %v867_v62, %v3224_v13  ;;  %v3241_v3 = vadd.f32 %v690_v34, %v3045_v55  ;;  %v1219_v6 = vadd.f32 1.0, %v3168_v5 }
 0x17b   :  { %v3244_v7 = vpop.eup %2695  ;;  %2707 = vtanh.f32 %v1119_v46  ;;  %1964 = vmatpush1.bf16.msra.mxu0 %v2621_v38  ;;  %v994_v9 = vmul.f32 0.044715, %v930_v47  ;;  %v934_v11 = vmul.f32 %v870_v56, %v3230_v59  ;;  %v1223_v12 = vadd.f32 1.0, %v3177_v20  ;;  %v694_v21 = vpop.f32.mrb[24].mxu1  ;;  %v2627_v56 = vld [vmem:[#allocation8 + $0x120] ss:$8 sps:$4 sm:$0xff]  }
 0x17c   :  { %v3248_v1 = vpop.eup %2697  ;;  %1965 = vmatprep.subr.bf16.mxu0 %v2626_v44  ;;  %v995_v19 = vmul.f32 0.044715, %v931_v2  ;;  %v871_v26 = vmul.f32 %v3241_v3, %v3241_v3  ;;  %v1283_v22 = vmul.f32 0.5, %v1219_v6  ;;  %v1218_v5 = vadd.f32 1.0, %v3165_v63  ;;  %v696_v52 = vpop.f32.mrb[25].mxu1 }
 0x17d   :  { %v3253_v31 = vpop.eup %2699  ;;  %v1058_v29 = vadd.f32 %v994_v9, %v3219_v30  ;;  %v998_v34 = vmul.f32 0.044715, %v934_v11  ;;  %v1287_v35 = vmul.f32 0.5, %v1223_v12  ;;  %v1222_v20 = vadd.f32 1.0, %v3171_v10  ;;  %v698_v36 = vpop.f32.mrb[26].mxu1 }
 0x17e   :  { %v1059_v38 = vadd.f32 %v995_v19, %v3224_v13  ;;  %v935_v57 = vmul.f32 %v871_v26, %v3241_v3  ;;  %v1347_v41 = vmul.f32 %v1283_v22, %v3076_v17  ;;  %v1282_v42 = vmul.f32 0.5, %v1218_v5  ;;  %v700_v44 = vpop.f32.mrb[27].mxu1  ;;  %v2632_v11 = vld [vmem:[#allocation8 + $0x134] ss:$8 sps:$4 sm:$0xff]   ;;  %v2630_v22 = vld [vmem:[#allocation8 + $0x130] ss:$8 sps:$4 sm:$0xff]  }
 0x17f   :  { %v1122_v62 = vmul.f32 0.7978846, %v1058_v29  ;;  %1966 = vmatpush1.bf16.msra.mxu0 %v2624_v60  ;;  %v1062_v63 = vadd.f32 %v998_v34, %v3230_v59  ;;  %v1351_v46 = vmul.f32 %v1287_v35, %v3089_v27  ;;  %v1286_v47 = vmul.f32 0.5, %v1222_v20 }
 0x180   :  { %v1123_v2 = vmul.f32 0.7978846, %v1059_v38  ;;  %v999_v6 = vmul.f32 0.044715, %v935_v57  ;;  %v1346_v10 = vmul.f32 %v1282_v42, %v3073_v14  ;;  %1967 = vmatprep.subr.bf16.mxu0 %v2629_v18  ;;  %v3264_v9 = vadd.f32 %v694_v21, %v3040_v54  ;;  %v2635_v57 = vld [vmem:[#allocation8 + $0x144] ss:$8 sps:$4 sm:$0xff]  }
 0x181   :  { %2709 = vtanh.f32 %v1122_v62  ;;  %v1126_v17 = vmul.f32 0.7978846, %v1062_v63  ;;  %v1439_v12 = vpack.c.bf16 %v1351_v46, %v1347_v41  ;;  %v1350_v60 = vmul.f32 %v1286_v47, %v3084_v24 }
 0x182   :  { %v3267_v19 = vpop.eup %2701  ;;  %2711 = vtanh.f32 %v1123_v2  ;;  %v1063_v27 = vadd.f32 %v999_v6, %v3241_v3  ;;  %v874_v26 = vmul.f32 %v3264_v9, %v3264_v9  ;;  %v3273_v14 = vadd.f32 %v696_v52, %v3045_v55 }
 0x183   :  { %v3275_v18 = vpop.eup %2703  ;;  %2713 = vtanh.f32 %v1126_v17  ;;  %1892 = vmatprep.mubr.bf16.mxu0 %v1439_v12  ;;  %v1438_v21 = vpack.c.bf16 %v1350_v60, %v1346_v10  ;;  %1968 = vmatpush1.bf16.msra.mxu0 %v2627_v56  ;;  %v3278_v24 = vadd.f32 %v698_v36, %v3040_v54  ;;  %v3281_v5 = vadd.f32 %v700_v44, %v3045_v55  ;;  %v704_v29 = vpop.f32.mrb[28].mxu1  ;;  %v2633_v12 = vld [vmem:[#allocation8 + $0x140] ss:$8 sps:$4 sm:$0xff]  }
 0x184   :  { %v3283_v34 = vpop.eup %2705  ;;  %v1127_v35 = vmul.f32 0.7978846, %v1063_v27  ;;  %v938_v52 = vmul.f32 %v874_v26, %v3264_v9  ;;  %1969 = vmatprep.subr.bf16.mxu0 %v2632_v11  ;;  %v875_v20 = vmul.f32 %v3273_v14, %v3273_v14  ;;  %v1227_v38 = vadd.f32 1.0, %v3206_v0  ;;  %v706_v41 = vpop.f32.mrb[29].mxu1  ;;  %v2638_v26 = vld [vmem:[#allocation8 + $0x154] ss:$8 sps:$4 sm:$0xff]  }
 0x185   :  { %v3289_v42 = vpop.eup %2707  ;;  %1893 = vmatmul.mubr.bf16.gmra.mrb[4].mxu0 %v1438_v21  ;;  %v878_v36 = vmul.f32 %v3278_v24, %v3278_v24  ;;  %v879_v44 = vmul.f32 %v3281_v5, %v3281_v5  ;;  %v1231_v62 = vadd.f32 1.0, %v3214_v23  ;;  %v1226_v63 = vadd.f32 1.0, %v3202_v49  ;;  %v708_v46 = vpop.f32.mrb[30].mxu1 }
 0x186   :  { %2715 = vtanh.f32 %v1127_v35  ;;  %v1002_v47 = vmul.f32 0.044715, %v938_v52  ;;  %v939_v0 = vmul.f32 %v875_v20, %v3273_v14  ;;  %v1291_v56 = vmul.f32 0.5, %v1227_v38  ;;  %v710_v2 = vpop.f32.mrb[31].mxu1 }
 0x187   :  { %1970 = vmatpush1.bf16.msra.mxu0 %v2630_v22  ;;  %v942_v6 = vmul.f32 %v878_v36, %v3278_v24  ;;  %v943_v10 = vmul.f32 %v879_v44, %v3281_v5  ;;  %v1295_v11 = vmul.f32 0.5, %v1231_v62  ;;  %v1230_v17 = vadd.f32 1.0, %v3210_v8 }
 0x188   :  { %v1066_v23 = vadd.f32 %v1002_v47, %v3264_v9  ;;  %v1003_v60 = vmul.f32 0.044715, %v939_v0  ;;  %v1355_v49 = vmul.f32 %v1291_v56, %v3110_v48  ;;  %v1290_v27 = vmul.f32 0.5, %v1226_v63  ;;  %1971 = vmatprep.subr.bf16.mxu0 %v2635_v57 }
 0x189   :  { %v1006_v21 = vmul.f32 0.044715, %v942_v6  ;;  %v1007_v35 = vmul.f32 0.044715, %v943_v10  ;;  %v1359_v22 = vmul.f32 %v1295_v11, %v3122_v4  ;;  %v1294_v52 = vmul.f32 0.5, %v1230_v17 }
 0x18a   :  { %v1130_v20 = vmul.f32 0.7978846, %v1066_v23  ;;  %v1067_v38 = vadd.f32 %v1003_v60, %v3273_v14  ;;  %v1354_v36 = vmul.f32 %v1290_v27, %v3105_v43  ;;  %v3307_v8 = vadd.f32 %v704_v29, %v3040_v54  ;;  %v2636_v4 = vld [vmem:[#allocation8 + $0x150] ss:$8 sps:$4 sm:$0xff]   ;;  %v2641_v6 = vld [vmem:[#allocation8 + $0x164] ss:$8 sps:$4 sm:$0xff]  }
 0x18b   :  { %v3309_v44 = vpop.eup %2709  ;;  %v1070_v48 = vadd.f32 %v1006_v21, %v3278_v24  ;;  %v1071_v57 = vadd.f32 %v1007_v35, %v3281_v5  ;;  %v1443_v62 = vpack.c.bf16 %v1359_v22, %v1355_v49  ;;  %v1358_v63 = vmul.f32 %v1294_v52, %v3116_v61  ;;  %1972 = vmatpush1.bf16.msra.mxu0 %v2633_v12  ;;  %v747_v47 = vpop.f32.mrb[32].mxu1 }
 0x18c   :  { %v3314_v0 = vpop.eup %2711  ;;  %2717 = vtanh.f32 %v1130_v20  ;;  %v1131_v56 = vmul.f32 0.7978846, %v1067_v38  ;;  %v882_v43 = vmul.f32 %v3307_v8, %v3307_v8  ;;  %1973 = vmatprep.subr.bf16.mxu0 %v2638_v26  ;;  %v3319_v29 = vadd.f32 %v706_v41, %v3045_v55  ;;  %v3321_v10 = vpop.f32.mrb[33].mxu1 }
 0x18d   :  { %v3323_v11 = vpop.eup %2713  ;;  %v1134_v61 = vmul.f32 0.7978846, %v1070_v48  ;;  %v1135_v17 = vmul.f32 0.7978846, %v1071_v57  ;;  %1902 = vmatprep.mubr.bf16.mxu0 %v1443_v62  ;;  %v1442_v12 = vpack.c.bf16 %v1358_v63, %v1354_v36  ;;  %v3326_v23 = vadd.f32 %v708_v46, %v3040_v54  ;;  %v751_v60 = vpop.f32.mrb[34].mxu1 }
 0x18e   :  { %2719 = vtanh.f32 %v1131_v56  ;;  %v946_v49 = vmul.f32 %v882_v43, %v3307_v8  ;;  %v883_v41 = vmul.f32 %v3319_v29, %v3319_v29  ;;  %v3332_v27 = vadd.f32 %v710_v2, %v3045_v55  ;;  %v753_v26 = vpop.f32.mrb[35].mxu1  ;;  %v2639_v2 = vld [vmem:[#allocation8 + $0x160] ss:$8 sps:$4 sm:$0xff]  }
 0x18f   :  { %2721 = vtanh.f32 %v1134_v61  ;;  %1903 = vmatmul.mubr.bf16.gmra.mrb[8].mxu0 %v1442_v12  ;;  %v886_v21 = vmul.f32 %v3326_v23, %v3326_v23  ;;  %v1235_v35 = vadd.f32 1.0, %v3244_v7  ;;  %v1239_v54 = vadd.f32 1.0, %v3253_v31  ;;  %v2644_v7 = vld [vmem:[#allocation8 + $0x174] ss:$8 sps:$4 sm:$0xff]  }
 0x190   :  { %v3338_v46 = vpop.eup %2715  ;;  %2723 = vtanh.f32 %v1135_v17  ;;  %v1010_v22 = vmul.f32 0.044715, %v946_v49  ;;  %v947_v52 = vmul.f32 %v883_v41, %v3319_v29  ;;  %1974 = vmatpush1.bf16.msra.mxu0 %v2636_v4  ;;  %v887_v55 = vmul.f32 %v3332_v27, %v3332_v27  ;;  %v2642_v17 = vld [vmem:[#allocation8 + $0x170] ss:$8 sps:$4 sm:$0xff]  }
 0x191   :  { %v950_v20 = vmul.f32 %v886_v21, %v3326_v23  ;;  %v1299_v38 = vmul.f32 0.5, %v1235_v35  ;;  %v1303_v36 = vmul.f32 0.5, %v1239_v54  ;;  %v1234_v48 = vadd.f32 1.0, %v3237_v58  ;;  %1975 = vmatprep.subr.bf16.mxu0 %v2641_v6 }
 0x192   :  { %v1074_v31 = vadd.f32 %v1010_v22, %v3307_v8  ;;  %v1011_v57 = vmul.f32 0.044715, %v947_v52  ;;  %v951_v62 = vmul.f32 %v887_v55, %v3332_v27  ;;  %v1238_v63 = vadd.f32 1.0, %v3248_v1 }
 0x193   :  { %v1014_v4 = vmul.f32 0.044715, %v950_v20  ;;  %v1363_v56 = vmul.f32 %v1299_v38, %v3143_v32  ;;  %v1367_v43 = vmul.f32 %v1303_v36, %v3157_v45  ;;  %v1298_v61 = vmul.f32 0.5, %v1234_v48  ;;  %v3350_v12 = vpop.f32.mrb[36].mxu1  ;;  %v2647_v45 = vld [vmem:[#allocation8 + $0x184] ss:$8 sps:$4 sm:$0xff]  }
 0x194   :  { %v1138_v49 = vmul.f32 0.7978846, %v1074_v31  ;;  %v1075_v58 = vadd.f32 %v1011_v57, %v3319_v29  ;;  %v1015_v6 = vmul.f32 0.044715, %v951_v62  ;;  %v1302_v41 = vmul.f32 0.5, %v1238_v63  ;;  %1976 = vmatpush1.bf16.msra.mxu0 %v2639_v2  ;;  %v3353_v21 = vpop.f32.mrb[37].mxu1 }
 0x195   :  { %v1078_v35 = vadd.f32 %v1014_v4, %v3326_v23  ;;  %v1447_v1 = vpack.c.bf16 %v1367_v43, %v1363_v56  ;;  %v1362_v54 = vmul.f32 %v1298_v61, %v3139_v28  ;;  %v3358_v32 = vadd.f32 %v747_v47, %v3101_v40  ;;  %1977 = vmatprep.subr.bf16.mxu0 %v2644_v7  ;;  %v3360_v22 = vpop.f32.mrb[38].mxu1  ;;  %v2645_v62 = vld [vmem:[#allocation8 + $0x180] ss:$8 sps:$4 sm:$0xff]   ;;  %v2650_v56 = vld [vmem:[#allocation8 + $0x194] ss:$8 sps:$4 sm:$0xff]  }
 0x196   :  { %v3362_v52 = vpop.eup %2717  ;;  %2725 = vtanh.f32 %v1138_v49  ;;  %v1139_v55 = vmul.f32 0.7978846, %v1075_v58  ;;  %v1079_v2 = vadd.f32 %v1015_v6, %v3332_v27  ;;  %v1366_v20 = vmul.f32 %v1302_v41, %v3151_v37  ;;  %v3366_v38 = vpop.f32.mrb[39].mxu1 }
 0x197   :  { %v1142_v36 = vmul.f32 0.7978846, %v1078_v35  ;;  %1912 = vmatprep.mubr.bf16.mxu0 %v1447_v1  ;;  %v828_v28 = vmul.f32 %v3358_v32, %v3358_v32  ;;  %v3372_v47 = vadd.f32 %v3321_v10, %v3132_v16  ;;  %v3375_v48 = vadd.f32 %v751_v60, %v3101_v40  ;;  %v2648_v35 = vld [vmem:[#allocation8 + $0x190] ss:$8 sps:$4 sm:$0xff]  }
 0x198   :  { %v3377_v7 = vpop.eup %2719  ;;  %2727 = vtanh.f32 %v1139_v55  ;;  %v1143_v31 = vmul.f32 0.7978846, %v1079_v2  ;;  %v1446_v57 = vpack.c.bf16 %v1366_v20, %v1362_v54  ;;  %1978 = vmatpush1.bf16.msra.mxu0 %v2642_v17  ;;  %v3380_v37 = vadd.f32 %v753_v26, %v3132_v16 }
 0x199   :  { %v3382_v63 = vpop.eup %2721  ;;  %2729 = vtanh.f32 %v1142_v36  ;;  %v892_v4 = vmul.f32 %v828_v28, %v3358_v32  ;;  %v829_v10 = vmul.f32 %v3372_v47, %v3372_v47  ;;  %v832_v60 = vmul.f32 %v3375_v48, %v3375_v48  ;;  %1979 = vmatprep.subr.bf16.mxu0 %v2647_v45 }
 0x19a   :  { %v3389_v43 = vpop.eup %2723  ;;  %2731 = vtanh.f32 %v1143_v31  ;;  %1913 = vmatmul.mubr.bf16.gmra.mrb[12].mxu0 %v1446_v57  ;;  %v833_v26 = vmul.f32 %v3380_v37, %v3380_v37  ;;  %v1243_v61 = vadd.f32 1.0, %v3275_v18  ;;  %v1247_v17 = vadd.f32 1.0, %v3289_v42  ;;  %v2653_v18 = vld [vmem:[#allocation8 + $0x1a4] ss:$8 sps:$4 sm:$0xff]  }
 0x19b   :  { %v956_v49 = vmul.f32 0.044715, %v892_v4  ;;  %v893_v58 = vmul.f32 %v829_v10, %v3372_v47  ;;  %v896_v6 = vmul.f32 %v832_v60, %v3375_v48  ;;  %v1242_v41 = vadd.f32 1.0, %v3267_v19  ;;  %v3398_v1 = vpop.f32.mrb[40].mxu1 }
 0x19c   :  { %v897_v54 = vmul.f32 %v833_v26, %v3380_v37  ;;  %v1307_v45 = vmul.f32 0.5, %v1243_v61  ;;  %v1311_v55 = vmul.f32 0.5, %v1247_v17  ;;  %v1246_v2 = vadd.f32 1.0, %v3283_v34  ;;  %1980 = vmatpush1.bf16.msra.mxu0 %v2645_v62  ;;  %v3402_v20 = vpop.f32.mrb[41].mxu1 }
 0x19d   :  { %v1020_v42 = vadd.f32 %v956_v49, %v3358_v32  ;;  %v957_v36 = vmul.f32 0.044715, %v893_v58  ;;  %v960_v28 = vmul.f32 0.044715, %v896_v6  ;;  %v1306_v31 = vmul.f32 0.5, %v1242_v41  ;;  %1981 = vmatprep.subr.bf16.mxu0 %v2650_v56  ;;  %v3405_v19 = vpop.f32.mrb[42].mxu1 }
 0x19e   :  { %v961_v57 = vmul.f32 0.044715, %v897_v54  ;;  %v1371_v4 = vmul.f32 %v1307_v45, %v3181_v25  ;;  %v1375_v10 = vmul.f32 %v1311_v55, %v3194_v39  ;;  %v1310_v60 = vmul.f32 0.5, %v1246_v2  ;;  %v3409_v26 = vpop.f32.mrb[43].mxu1 }
 0x19f   :  { %v1084_v34 = vmul.f32 0.7978846, %v1020_v42  ;;  %v1021_v62 = vadd.f32 %v957_v36, %v3372_v47  ;;  %v1024_v61 = vadd.f32 %v960_v28, %v3375_v48  ;;  %v1370_v17 = vmul.f32 %v1306_v31, %v3175_v15  ;;  %v2651_v15 = vld [vmem:[#allocation8 + $0x1a0] ss:$8 sps:$4 sm:$0xff]  }
 0x1a0   :  { %v3414_v49 = vpop.eup %2725  ;;  %v1025_v56 = vadd.f32 %v961_v57, %v3380_v37  ;;  %v1451_v58 = vpack.c.bf16 %v1375_v10, %v1371_v4  ;;  %v1374_v6 = vmul.f32 %v1310_v60, %v3188_v33  ;;  %v3420_v25 = vadd.f32 %v3350_v12, %v3101_v40  ;;  %1982 = vmatpush1.bf16.msra.mxu0 %v2648_v35  ;;  %v2656_v35 = vld [vmem:[#allocation8 + $0x1b4] ss:$8 sps:$4 sm:$0xff]  }
 0x1a1   :  { %2733 = vtanh.f32 %v1084_v34  ;;  %v1085_v39 = vmul.f32 0.7978846, %v1021_v62  ;;  %v1088_v41 = vmul.f32 0.7978846, %v1024_v61  ;;  %v3424_v54 = vadd.f32 %v3353_v21, %v3132_v16  ;;  %1983 = vmatprep.subr.bf16.mxu0 %v2653_v18  ;;  %v2654_v34 = vld [vmem:[#allocation8 + $0x1b0] ss:$8 sps:$4 sm:$0xff]  }
 0x1a2   :  { %v3426_v45 = vpop.eup %2727  ;;  %v1089_v55 = vmul.f32 0.7978846, %v1025_v56  ;;  %1922 = vmatprep.mubr.bf16.mxu0 %v1451_v58  ;;  %v1450_v2 = vpack.c.bf16 %v1374_v6, %v1370_v17  ;;  %v836_v33 = vmul.f32 %v3420_v25, %v3420_v25  ;;  %v3432_v12 = vadd.f32 %v3360_v22, %v3101_v40  ;;  %v2659_v62 = vld [vmem:[#allocation8 + $0x1c4] ss:$8 sps:$4 sm:$0xff]  }
 0x1a3   :  { %v3434_v42 = vpop.eup %2729  ;;  %2735 = vtanh.f32 %v1085_v39  ;;  %v837_v21 = vmul.f32 %v3424_v54, %v3424_v54  ;;  %v3440_v18 = vadd.f32 %v3366_v38, %v3132_v16  ;;  %v1251_v36 = vadd.f32 1.0, %v3314_v0  ;;  %v3443_v28 = vpop.f32.mrb[44].mxu1 }
 0x1a4   :  { %v3445_v31 = vpop.eup %2731  ;;  %2737 = vtanh.f32 %v1088_v41  ;;  %1923 = vmatmul.mubr.bf16.gmra.mrb[16].mxu0 %v1450_v2  ;;  %v900_v22 = vmul.f32 %v836_v33, %v3420_v25  ;;  %v840_v57 = vmul.f32 %v3432_v12, %v3432_v12  ;;  %v1255_v4 = vadd.f32 1.0, %v3338_v46  ;;  %v3451_v10 = vpop.f32.mrb[45].mxu1 }
 0x1a5   :  { %2739 = vtanh.f32 %v1089_v55  ;;  %v901_v38 = vmul.f32 %v837_v21, %v3424_v54  ;;  %v841_v0 = vmul.f32 %v3440_v18, %v3440_v18  ;;  %v1315_v60 = vmul.f32 0.5, %v1251_v36  ;;  %1984 = vmatpush1.bf16.msra.mxu0 %v2651_v15  ;;  %v3456_v61 = vpop.f32.mrb[46].mxu1 }
 0x1a6   :  { %v964_v17 = vmul.f32 0.044715, %v900_v22  ;;  %v904_v56 = vmul.f32 %v840_v57, %v3432_v12  ;;  %v1319_v58 = vmul.f32 0.5, %v1255_v4  ;;  %v1250_v46 = vadd.f32 1.0, %v3309_v44  ;;  %1985 = vmatprep.subr.bf16.mxu0 %v2656_v35  ;;  %v3460_v6 = vpop.f32.mrb[47].mxu1 }
 0x1a7   :  { %v965_v39 = vmul.f32 0.044715, %v901_v38  ;;  %v905_v41 = vmul.f32 %v841_v0, %v3440_v18  ;;  %v1379_v55 = vmul.f32 %v1315_v60, %v3224_v13  ;;  %v1254_v15 = vadd.f32 1.0, %v3323_v11  ;;  %v2657_v4 = vld [vmem:[#allocation8 + $0x1c0] ss:$8 sps:$4 sm:$0xff]  }
 0x1a8   :  { %v1028_v2 = vadd.f32 %v964_v17, %v3420_v25  ;;  %v968_v33 = vmul.f32 0.044715, %v904_v56  ;;  %v1383_v21 = vmul.f32 %v1319_v58, %v3241_v3  ;;  %v1314_v36 = vmul.f32 0.5, %v1250_v46  ;;  %v2662_v60 = vld [vmem:[#allocation8 + $0x1d4] ss:$8 sps:$4 sm:$0xff]  }
 0x1a9   :  { %v1029_v22 = vadd.f32 %v965_v39, %v3424_v54  ;;  %v969_v57 = vmul.f32 0.044715, %v905_v41  ;;  %v1318_v44 = vmul.f32 0.5, %v1254_v15  ;;  %v3470_v35 = vadd.f32 %v3398_v1, %v3101_v40  ;;  %1986 = vmatpush1.bf16.msra.mxu0 %v2654_v34 }
 0x1aa   :  { %v1092_v38 = vmul.f32 0.7978846, %v1028_v2  ;;  %v1032_v13 = vadd.f32 %v968_v33, %v3432_v12  ;;  %v1455_v11 = vpack.c.bf16 %v1383_v21, %v1379_v55  ;;  %v1378_v0 = vmul.f32 %v1314_v36, %v3219_v30  ;;  %1987 = vmatprep.subr.bf16.mxu0 %v2659_v62  ;;  %v2660_v2 = vld [vmem:[#allocation8 + $0x1d0] ss:$8 sps:$4 sm:$0xff]  }
 0x1ab   :  { %v2734_v3 = vpop.eup %2733  ;;  %v1093_v17 = vmul.f32 0.7978846, %v1029_v22  ;;  %v1033_v56 = vadd.f32 %v969_v57, %v3440_v18  ;;  %v1382_v58 = vmul.f32 %v1318_v44, %v3230_v59  ;;  %v844_v1 = vmul.f32 %v3470_v35, %v3470_v35  ;;  %v3478_v46 = vpop.f32.mrb[48].mxu1  ;;  %v2665_v57 = vld [vmem:[#allocation8 + $0x1e4] ss:$8 sps:$4 sm:$0xff]  }
 0x1ac   :  { %v1212_v34 = vadd.f32 1.0, %v2734_v3  ;;  %2741 = vtanh.f32 %v1092_v38  ;;  %v1096_v39 = vmul.f32 0.7978846, %v1032_v13  ;;  %1932 = vmatprep.mubr.bf16.mxu0 %v1455_v11  ;;  %v3482_v30 = vadd.f32 %v3402_v20, %v3132_v16  ;;  %v3484_v62 = vpop.f32.mrb[49].mxu1 }
 0x1ad   :  { %v3486_v41 = vpop.eup %2735  ;;  %2743 = vtanh.f32 %v1093_v17  ;;  %v1097_v55 = vmul.f32 0.7978846, %v1033_v56  ;;  %v1454_v59 = vpack.c.bf16 %v1382_v58, %v1378_v0  ;;  %v908_v15 = vmul.f32 %v844_v1, %v3470_v35  ;;  %1988 = vmatpush1.bf16.msra.mxu0 %v2657_v4  ;;  %v3489_v33 = vpop.f32.mrb[50].mxu1 }
 0x1ae   :  { %v2738_v21 = vpop.eup %2737  ;;  %v1276_v36 = vmul.f32 0.5, %v1212_v34  ;;  %2745 = vtanh.f32 %v1096_v39  ;;  %v845_v20 = vmul.f32 %v3482_v30, %v3482_v30  ;;  %v3495_v22 = vadd.f32 %v3405_v19, %v3101_v40  ;;  %1989 = vmatprep.subr.bf16.mxu0 %v2662_v60  ;;  %v3497_v44 = vpop.f32.mrb[51].mxu1 }
 0x1af   :  { %v3499_v38 = vpop.eup %2739  ;;  %v1216_v4 = vadd.f32 1.0, %v2738_v21  ;;  %2747 = vtanh.f32 %v1097_v55  ;;  %1933 = vmatmul.mubr.bf16.gmra.mrb[20].mxu0 %v1454_v59  ;;  %v972_v13 = vmul.f32 0.044715, %v908_v15  ;;  %v3503_v11 = vadd.f32 %v3409_v26, %v3132_v16  ;;  %v2663_v26 = vld [vmem:[#allocation8 + $0x1e0] ss:$8 sps:$4 sm:$0xff]  }
 0x1b0   :  { %v3506_v0 = vmul.f32 %v1276_v36, %v3358_v32  ;;  %v909_v19 = vmul.f32 %v845_v20, %v3482_v30  ;;  %v848_v60 = vmul.f32 %v3495_v22, %v3495_v22  ;;  %v1259_v3 = vadd.f32 1.0, %v3377_v7  ;;  %v2668_v59 = vld [vmem:[#allocation8 + $0x1f4] ss:$8 sps:$4 sm:$0xff]  }
 0x1b1   :  { %v1280_v17 = vmul.f32 0.5, %v1216_v4  ;;  %v1036_v56 = vadd.f32 %v972_v13, %v3470_v35  ;;  %v849_v58 = vmul.f32 %v3503_v11, %v3503_v11  ;;  %v1263_v1 = vadd.f32 1.0, %v3389_v43  ;;  %1990 = vmatpush1.bf16.msra.mxu0 %v2660_v2 }
 0x1b2   :  { %v973_v34 = vmul.f32 0.044715, %v909_v19  ;;  %v912_v32 = vmul.f32 %v848_v60, %v3495_v22  ;;  %v1323_v39 = vmul.f32 0.5, %v1259_v3  ;;  %v1258_v55 = vadd.f32 1.0, %v3362_v52  ;;  %1991 = vmatprep.subr.bf16.mxu0 %v2665_v57  ;;  %v2666_v60 = vld [vmem:[#allocation8 + $0x1f0] ss:$8 sps:$4 sm:$0xff]  }
 0x1b3   :  { %v3519_v7 = vmul.f32 %v1280_v17, %v3375_v48  ;;  %v1100_v15 = vmul.f32 0.7978846, %v1036_v56  ;;  %v913_v21 = vmul.f32 %v849_v58, %v3503_v11  ;;  %v1327_v36 = vmul.f32 0.5, %v1263_v1  ;;  %v3522_v20 = vpop.f32.mrb[52].mxu1 }
 0x1b4   :  { %v1037_v43 = vadd.f32 %v973_v34, %v3482_v30  ;;  %v976_v2 = vmul.f32 0.044715, %v912_v32  ;;  %v1387_v4 = vmul.f32 %v1323_v39, %v3273_v14  ;;  %v1262_v13 = vadd.f32 1.0, %v3382_v63  ;;  %v3527_v19 = vpop.f32.mrb[53].mxu1 }
 0x1b5   :  { %v1436_v52 = vpack.c.bf16 %v3519_v7, %v3506_v0  ;;  %2749 = vtanh.f32 %v1100_v15  ;;  %v977_v48 = vmul.f32 0.044715, %v913_v21  ;;  %v1391_v57 = vmul.f32 %v1327_v36, %v3281_v5  ;;  %1992 = vmatpush1.bf16.msra.mxu0 %v2663_v26  ;;  %v3532_v3 = vpop.f32.mrb[54].mxu1 }
 0x1b6   :  { %v3534_v17 = vpop.eup %2741  ;;  %v1101_v56 = vmul.f32 0.7978846, %v1037_v43  ;;  %v1040_v14 = vadd.f32 %v976_v2, %v3495_v22  ;;  %v1322_v58 = vmul.f32 0.5, %v1258_v55  ;;  %v1326_v63 = vmul.f32 0.5, %v1262_v13  ;;  %1993 = vmatprep.subr.bf16.mxu0 %v2668_v59  ;;  %v3537_v1 = vpop.f32.mrb[55].mxu1 }
 0x1b7   :  { %v3539_v34 = vpop.eup %2743  ;;  %v1041_v32 = vadd.f32 %v977_v48, %v3503_v11  ;;  %v1459_v39 = vpack.c.bf16 %v1391_v57, %v1387_v4  ;;  %v3544_v5 = vadd.f32 %v3443_v28, %v3101_v40  ;;  %v3548_v26 = vadd.f32 %v3451_v10, %v3132_v16 }
 0x1b8   :  { %v3550_v15 = vpop.eup %2745  ;;  %2751 = vtanh.f32 %v1101_v56  ;;  %v1104_v55 = vmul.f32 0.7978846, %v1040_v14  ;;  %v1386_v59 = vmul.f32 %v1322_v58, %v3264_v9  ;;  %v1390_v21 = vmul.f32 %v1326_v63, %v3278_v24 }
 0x1b9   :  { %v3554_v36 = vpop.eup %2747  ;;  %v1105_v43 = vmul.f32 0.7978846, %v1041_v32  ;;  %1942 = vmatprep.mubr.bf16.mxu0 %v1459_v39  ;;  %v852_v28 = vmul.f32 %v3544_v5, %v3544_v5  ;;  %v853_v2 = vmul.f32 %v3548_v26, %v3548_v26  ;;  %v3562_v10 = vadd.f32 %v3456_v61, %v3101_v40  ;;  %1994 = vmatpush1.bf16.msra.mxu0 %v2666_v60 }
 0x1ba   :  { %2753 = vtanh.f32 %v1104_v55  ;;  %v1458_v4 = vpack.c.bf16 %v1390_v21, %v1386_v59  ;;  %v3566_v9 = vadd.f32 %v3460_v6, %v3132_v16  ;;  %v1267_v24 = vadd.f32 1.0, %v3426_v45 }
 0x1bb   :  { %2755 = vtanh.f32 %v1105_v43  ;;  %v916_v13 = vmul.f32 %v852_v28, %v3544_v5  ;;  %v917_v48 = vmul.f32 %v853_v2, %v3548_v26  ;;  %v856_v57 = vmul.f32 %v3562_v10, %v3562_v10  ;;  %v3573_v56 = vpop.f32.mrb[56].mxu1 }
 0x1bc   :  { %1943 = vmatmul.mubr.bf16.gmra.mrb[24].mxu0 %v1458_v4  ;;  %v857_v61 = vmul.f32 %v3566_v9, %v3566_v9  ;;  %v1271_v60 = vadd.f32 1.0, %v3445_v31  ;;  %v1331_v6 = vmul.f32 0.5, %v1267_v24  ;;  %v1266_v14 = vadd.f32 1.0, %v3414_v49  ;;  %v3579_v45 = vpop.f32.mrb[57].mxu1 }
 0x1bd   :  { %v980_v58 = vmul.f32 0.044715, %v916_v13  ;;  %v981_v63 = vmul.f32 0.044715, %v917_v48  ;;  %v920_v32 = vmul.f32 %v856_v57, %v3562_v10  ;;  %v1270_v39 = vadd.f32 1.0, %v3434_v42  ;;  %v3583_v55 = vpop.f32.mrb[58].mxu1 }
 0x1be   :  { %v921_v59 = vmul.f32 %v857_v61, %v3566_v9  ;;  %v1335_v21 = vmul.f32 0.5, %v1271_v60  ;;  %v1395_v43 = vmul.f32 %v1331_v6, %v3319_v29  ;;  %v1330_v28 = vmul.f32 0.5, %v1266_v14  ;;  %v3587_v31 = vpop.f32.mrb[59].mxu1 }
 0x1bf   :  { %v3589_v2 = vpop.eup %2749  ;;  %v1044_v49 = vadd.f32 %v980_v58, %v3544_v5  ;;  %v1045_v4 = vadd.f32 %v981_v63, %v3548_v26  ;;  %v984_v24 = vmul.f32 0.044715, %v920_v32  ;;  %v1334_v13 = vmul.f32 0.5, %v1270_v39 }
 0x1c0   :  { %v985_v48 = vmul.f32 0.044715, %v921_v59  ;;  %v1399_v42 = vmul.f32 %v1335_v21, %v3332_v27  ;;  %v1394_v57 = vmul.f32 %v1330_v28, %v3307_v8  ;;  %v3597_v61 = vadd.f32 %v3478_v46, %v3101_v40 }
 0x1c1   :  { %v1108_v29 = vmul.f32 0.7978846, %v1044_v49  ;;  %v1109_v60 = vmul.f32 0.7978846, %v1045_v4  ;;  %v1048_v6 = vadd.f32 %v984_v24, %v3562_v10  ;;  %v1398_v14 = vmul.f32 %v1334_v13, %v3326_v23 }
 0x1c2   :  { %v3601_v58 = vpop.eup %2751  ;;  %v1049_v63 = vadd.f32 %v985_v48, %v3566_v9  ;;  %v1463_v32 = vpack.c.bf16 %v1399_v42, %v1395_v43  ;;  %v860_v27 = vmul.f32 %v3597_v61, %v3597_v61  ;;  %v3608_v8 = vadd.f32 %v3484_v62, %v3132_v16 }
 0x1c3   :  { %2757 = vtanh.f32 %v1108_v29  ;;  %v1112_v46 = vmul.f32 0.7978846, %v1048_v6  ;;  %v1462_v39 = vpack.c.bf16 %v1398_v14, %v1394_v57  ;;  %v3612_v59 = vadd.f32 %v3489_v33, %v3101_v40  ;;  %v3614_v23 = vpop.f32.mrb[60].mxu1 }
 0x1c4   :  { %v3616_v21 = vpop.eup %2753  ;;  %2759 = vtanh.f32 %v1109_v60  ;;  %v1113_v43 = vmul.f32 0.7978846, %v1049_v63  ;;  %1952 = vmatprep.mubr.bf16.mxu0 %v1463_v32  ;;  %v924_v28 = vmul.f32 %v860_v27, %v3597_v61  ;;  %v861_v62 = vmul.f32 %v3608_v8, %v3608_v8  ;;  %v3621_v49 = vpop.f32.mrb[61].mxu1 }
 0x1c5   :  { %v3623_v4 = vpop.eup %2755  ;;  %2761 = vtanh.f32 %v1112_v46  ;;  %1953 = vmatmul.mubr.bf16.gmra.mrb[28].mxu0 %v1462_v39  ;;  %v864_v33 = vmul.f32 %v3612_v59, %v3612_v59  ;;  %v3629_v24 = vadd.f32 %v3497_v44, %v3132_v16  ;;  %v1213_v13 = vadd.f32 1.0, %v3486_v41  ;;  %v3632_v48 = vpop.f32.mrb[62].mxu1 }
 0x1c6   :  { %2763 = vtanh.f32 %v1113_v43  ;;  %v988_v42 = vmul.f32 0.044715, %v924_v28  ;;  %v925_v57 = vmul.f32 %v861_v62, %v3608_v8  ;;  %v1217_v29 = vadd.f32 1.0, %v3499_v38  ;;  %v3636_v60 = vpop.f32.mrb[63].mxu1 }
 0x1c7   :  { %v928_v6 = vmul.f32 %v864_v33, %v3612_v59  ;;  %v865_v14 = vmul.f32 %v3629_v24, %v3629_v24  ;;  %v1277_v63 = vmul.f32 0.5, %v1213_v13  ;;  %v3643_v44 = vadd.f32 %v3522_v20, %v3101_v40 }
 0x1c8   :  { %v1052_v41 = vadd.f32 %v988_v42, %v3597_v61  ;;  %v989_v32 = vmul.f32 0.044715, %v925_v57  ;;  %v1281_v27 = vmul.f32 0.5, %v1217_v29  ;;  %v3648_v46 = vadd.f32 %v3527_v19, %v3132_v16 }
 0x1c9   :  { %v992_v38 = vmul.f32 0.044715, %v928_v6  ;;  %v929_v39 = vmul.f32 %v865_v14, %v3629_v24  ;;  %v1341_v43 = vmul.f32 %v1277_v63, %v3372_v47  ;;  %v868_v28 = vmul.f32 %v3643_v44, %v3643_v44 }
 0x1ca   :  { %v1116_v62 = vmul.f32 0.7978846, %v1052_v41  ;;  %v1053_v20 = vadd.f32 %v989_v32, %v3608_v8  ;;  %v1345_v33 = vmul.f32 %v1281_v27, %v3380_v37  ;;  %v869_v13 = vmul.f32 %v3648_v46, %v3648_v46 }
 0x1cb   :  { %v1056_v42 = vadd.f32 %v992_v38, %v3612_v59  ;;  %v993_v19 = vmul.f32 0.044715, %v929_v39  ;;  %v932_v57 = vmul.f32 %v868_v28, %v3643_v44  ;;  %v3662_v29 = vadd.f32 %v3532_v3, %v3101_v40 }
 0x1cc   :  { %2765 = vtanh.f32 %v1116_v62  ;;  %v1117_v47 = vmul.f32 0.7978846, %v1053_v20  ;;  %v1437_v6 = vpack.c.bf16 %v1345_v33, %v1341_v43  ;;  %v933_v14 = vmul.f32 %v869_v13, %v3648_v46 }
 0x1cd   :  { %v3665_v63 = vpop.eup %2757  ;;  %v1120_v37 = vmul.f32 0.7978846, %v1056_v42  ;;  %v1057_v41 = vadd.f32 %v993_v19, %v3629_v24  ;;  %v996_v32 = vmul.f32 0.044715, %v932_v57  ;;  %v872_v27 = vmul.f32 %v3662_v29, %v3662_v29 }
 0x1ce   :  { %v3670_v38 = vpop.eup %2759  ;;  %2767 = vtanh.f32 %v1117_v47  ;;  %1995 = vmatprep.mubr.bf16.mxu0 %v1437_v6  ;;  %v997_v3 = vmul.f32 0.044715, %v933_v14  ;;  %v3674_v39 = vadd.f32 %v3537_v1, %v3132_v16  ;;  %v1221_v43 = vadd.f32 1.0, %v3539_v34 }
 0x1cf   :  { %v3677_v28 = vpop.eup %2761  ;;  %2769 = vtanh.f32 %v1120_v37  ;;  %v1121_v62 = vmul.f32 0.7978846, %v1057_v41  ;;  %1996 = vmatmul.mubr.bf16.vlgmr.msra.gmra.mrb[0].mxu0 %v1436_v52  ;;  %v1060_v20 = vadd.f32 %v996_v32, %v3643_v44  ;;  %v936_v33 = vmul.f32 %v872_v27, %v3662_v29 }
 0x1d0   :  { %v3684_v13 = vpop.eup %2763  ;;  %v1061_v42 = vadd.f32 %v997_v3, %v3648_v46  ;;  %v873_v1 = vmul.f32 %v3674_v39, %v3674_v39  ;;  %v1225_v34 = vadd.f32 1.0, %v3554_v36  ;;  %v1285_v19 = vmul.f32 0.5, %v1221_v43 }
 0x1d1   :  { %2771 = vtanh.f32 %v1121_v62  ;;  %v1124_v57 = vmul.f32 0.7978846, %v1060_v20  ;;  %v1000_v47 = vmul.f32 0.044715, %v936_v33  ;;  %v1220_v0 = vadd.f32 1.0, %v3534_v17 }
 0x1d2   :  { %v1125_v7 = vmul.f32 0.7978846, %v1061_v42  ;;  %v937_v52 = vmul.f32 %v873_v1, %v3674_v39  ;;  %v1289_v6 = vmul.f32 0.5, %v1225_v34  ;;  %v1349_v14 = vmul.f32 %v1285_v19, %v3424_v54 }
 0x1d3   :  { %2773 = vtanh.f32 %v1124_v57  ;;  %v1064_v37 = vadd.f32 %v1000_v47, %v3662_v29  ;;  %v1224_v41 = vadd.f32 1.0, %v3550_v15  ;;  %v1284_v32 = vmul.f32 0.5, %v1220_v0 }
 0x1d4   :  { %2775 = vtanh.f32 %v1125_v7  ;;  %v1001_v36 = vmul.f32 0.044715, %v937_v52  ;;  %v1353_v27 = vmul.f32 %v1289_v6, %v3440_v18  ;;  %v3698_v3 = vadd.f32 %v3573_v56, %v3101_v40 }
 0x1d5   :  { %v1128_v17 = vmul.f32 0.7978846, %v1064_v37  ;;  %v1288_v43 = vmul.f32 0.5, %v1224_v41  ;;  %v1348_v62 = vmul.f32 %v1284_v32, %v3420_v25  ;;  %v3703_v54 = vadd.f32 %v3579_v45, %v3132_v16 }
 0x1d6   :  { %v3705_v20 = vpop.eup %2765  ;;  %v1065_v15 = vadd.f32 %v1001_v36, %v3674_v39  ;;  %v1441_v33 = vpack.c.bf16 %v1353_v27, %v1349_v14  ;;  %v876_v18 = vmul.f32 %v3698_v3, %v3698_v3  ;;  %v3712_v56 = vadd.f32 %v3583_v55, %v3101_v40 }
 0x1d7   :  { %2777 = vtanh.f32 %v1128_v17  ;;  %v1352_v42 = vmul.f32 %v1288_v43, %v3432_v12  ;;  %v877_v25 = vmul.f32 %v3703_v54, %v3703_v54  ;;  %v3719_v45 = vadd.f32 %v3587_v31, %v3132_v16 }
 0x1d8   :  { %v3721_v1 = vpop.eup %2767  ;;  %v1129_v34 = vmul.f32 0.7978846, %v1065_v15  ;;  %2005 = vmatprep.mubr.bf16.mxu0 %v1441_v33  ;;  %v940_v19 = vmul.f32 %v876_v18, %v3698_v3  ;;  %v880_v55 = vmul.f32 %v3712_v56, %v3712_v56  ;;  %v1229_v57 = vadd.f32 1.0, %v3601_v58 }
 0x1d9   :  { %v3727_v47 = vpop.eup %2769  ;;  %v1440_v12 = vpack.c.bf16 %v1352_v42, %v1348_v62  ;;  %v941_v0 = vmul.f32 %v877_v25, %v3703_v54  ;;  %v881_v31 = vmul.f32 %v3719_v45, %v3719_v45  ;;  %v1233_v7 = vadd.f32 1.0, %v3623_v4 }
 0x1da   :  { %2779 = vtanh.f32 %v1129_v34  ;;  %v1004_v52 = vmul.f32 0.044715, %v940_v19  ;;  %v944_v6 = vmul.f32 %v880_v55, %v3712_v56  ;;  %v1293_v14 = vmul.f32 0.5, %v1229_v57 }
 0x1db   :  { %v3734_v37 = vpop.eup %2771  ;;  %2006 = vmatmul.mubr.bf16.gmra.mrb[4].mxu0 %v1440_v12  ;;  %v1005_v41 = vmul.f32 0.044715, %v941_v0  ;;  %v945_v58 = vmul.f32 %v881_v31, %v3719_v45  ;;  %v1297_v32 = vmul.f32 0.5, %v1233_v7  ;;  %v1228_v36 = vadd.f32 1.0, %v3589_v2 }
 0x1dc   :  { %v1068_v27 = vadd.f32 %v1004_v52, %v3698_v3  ;;  %v1008_v17 = vmul.f32 0.044715, %v944_v6  ;;  %v1357_v43 = vmul.f32 %v1293_v14, %v3482_v30  ;;  %v1232_v4 = vadd.f32 1.0, %v3616_v21 }
 0x1dd   :  { %v3741_v62 = vpop.eup %2773  ;;  %v1069_v15 = vadd.f32 %v1005_v41, %v3703_v54  ;;  %v1009_v33 = vmul.f32 0.044715, %v945_v58  ;;  %v1361_v18 = vmul.f32 %v1297_v32, %v3503_v11  ;;  %v1292_v42 = vmul.f32 0.5, %v1228_v36 }
 0x1de   :  { %v3745_v25 = vpop.eup %2775  ;;  %v1132_v34 = vmul.f32 0.7978846, %v1068_v27  ;;  %v1072_v2 = vadd.f32 %v1008_v17, %v3712_v56  ;;  %v1296_v19 = vmul.f32 0.5, %v1232_v4  ;;  %v3750_v55 = vadd.f32 %v3614_v23, %v3101_v40 }
 0x1df   :  { %v1133_v30 = vmul.f32 0.7978846, %v1069_v15  ;;  %v1073_v21 = vadd.f32 %v1009_v33, %v3719_v45  ;;  %v1445_v57 = vpack.c.bf16 %v1361_v18, %v1357_v43  ;;  %v1356_v12 = vmul.f32 %v1292_v42, %v3470_v35 }
 0x1e0   :  { %2781 = vtanh.f32 %v1132_v34  ;;  %v1136_v0 = vmul.f32 0.7978846, %v1072_v2  ;;  %v1360_v11 = vmul.f32 %v1296_v19, %v3495_v22  ;;  %v884_v31 = vmul.f32 %v3750_v55, %v3750_v55 }
 0x1e1   :  { %v3757_v7 = vpop.eup %2777  ;;  %2783 = vtanh.f32 %v1133_v30  ;;  %v1137_v52 = vmul.f32 0.7978846, %v1073_v21  ;;  %2015 = vmatprep.mubr.bf16.mxu0 %v1445_v57  ;;  %v3761_v23 = vadd.f32 %v3621_v49, %v3132_v16  ;;  %v3765_v6 = vadd.f32 %v3632_v48, %v3101_v40 }
 0x1e2   :  { %2785 = vtanh.f32 %v1136_v0  ;;  %v1444_v35 = vpack.c.bf16 %v1360_v11, %v1356_v12  ;;  %v948_v22 = vmul.f32 %v884_v31, %v3750_v55  ;;  %v3770_v14 = vadd.f32 %v3636_v60, %v3132_v16 }
 0x1e3   :  { %2787 = vtanh.f32 %v1137_v52  ;;  %v885_v41 = vmul.f32 %v3761_v23, %v3761_v23  ;;  %v888_v49 = vmul.f32 %v3765_v6, %v3765_v6  ;;  %v1237_v58 = vadd.f32 1.0, %v3670_v38 }
 0x1e4   :  { %v2780_v32 = vpop.eup %2779  ;;  %2016 = vmatmul.mubr.bf16.gmra.mrb[8].mxu0 %v1444_v35  ;;  %v1012_v40 = vmul.f32 0.044715, %v948_v22  ;;  %v889_v48 = vmul.f32 %v3770_v14, %v3770_v14  ;;  %v1241_v36 = vadd.f32 1.0, %v3684_v13  ;;  %v1236_v16 = vadd.f32 1.0, %v3665_v63 }
 0x1e5   :  { %v949_v60 = vmul.f32 %v885_v41, %v3761_v23  ;;  %v952_v27 = vmul.f32 %v888_v49, %v3765_v6  ;;  %v1301_v17 = vmul.f32 0.5, %v1237_v58  ;;  %v1240_v43 = vadd.f32 1.0, %v3677_v28 }
 0x1e6   :  { %v1076_v4 = vadd.f32 %v1012_v40, %v3750_v55  ;;  %v953_v38 = vmul.f32 %v889_v48, %v3770_v14  ;;  %v1305_v15 = vmul.f32 0.5, %v1241_v36  ;;  %v1300_v33 = vmul.f32 0.5, %v1236_v16 }
 0x1e7   :  { %v1013_v18 = vmul.f32 0.044715, %v949_v60  ;;  %v1016_v42 = vmul.f32 0.044715, %v952_v27  ;;  %v1365_v34 = vmul.f32 %v1301_v17, %v3548_v26  ;;  %v1304_v13 = vmul.f32 0.5, %v1240_v43 }
 0x1e8   :  { %v1140_v2 = vmul.f32 0.7978846, %v1076_v4  ;;  %v1017_v63 = vmul.f32 0.044715, %v953_v38  ;;  %v1369_v19 = vmul.f32 %v1305_v15, %v3566_v9  ;;  %v1364_v30 = vmul.f32 %v1300_v33, %v3544_v5 }
 0x1e9   :  { %v1077_v21 = vadd.f32 %v1013_v18, %v3761_v23  ;;  %v1080_v28 = vadd.f32 %v1016_v42, %v3765_v6  ;;  %v1368_v57 = vmul.f32 %v1304_v13, %v3562_v10  ;;  %v1245_v12 = vadd.f32 1.0, %v3721_v1 }
 0x1ea   :  { %v2782_v0 = vpop.eup %2781  ;;  %2789 = vtanh.f32 %v1140_v2  ;;  %v1081_v11 = vadd.f32 %v1017_v63, %v3770_v14  ;;  %v1449_v26 = vpack.c.bf16 %v1369_v19, %v1365_v34  ;;  %v1249_v31 = vadd.f32 1.0, %v3734_v37 }
 0x1eb   :  { %v2784_v52 = vpop.eup %2783  ;;  %v1141_v35 = vmul.f32 0.7978846, %v1077_v21  ;;  %v1144_v9 = vmul.f32 0.7978846, %v1080_v28  ;;  %v1448_v22 = vpack.c.bf16 %v1368_v57, %v1364_v30  ;;  %v1309_v5 = vmul.f32 0.5, %v1245_v12 }
 0x1ec   :  { %v2786_v41 = vpop.eup %2785  ;;  %v1145_v49 = vmul.f32 0.7978846, %v1081_v11  ;;  %2025 = vmatprep.mubr.bf16.mxu0 %v1449_v26  ;;  %v1313_v58 = vmul.f32 0.5, %v1249_v31  ;;  %v1244_v10 = vadd.f32 1.0, %v3705_v20  ;;  %v1248_v1 = vadd.f32 1.0, %v3727_v47 }
 0x1ed   :  { %v2788_v40 = vpop.eup %2787  ;;  %2791 = vtanh.f32 %v1141_v35  ;;  %2026 = vmatmul.mubr.bf16.gmra.mrb[12].mxu0 %v1448_v22  ;;  %v1373_v48 = vmul.f32 %v1309_v5, %v3608_v8  ;;  %v1253_v37 = vadd.f32 1.0, %v3745_v25  ;;  %v1257_v36 = vadd.f32 1.0, %v2780_v32 }
 0x1ee   :  { %2793 = vtanh.f32 %v1144_v9  ;;  %v1377_v16 = vmul.f32 %v1313_v58, %v3629_v24  ;;  %v1308_v60 = vmul.f32 0.5, %v1244_v10  ;;  %v1312_v27 = vmul.f32 0.5, %v1248_v1  ;;  %v2175_v10 = vld [vmem:[%s3878_s4] sm:$0x3]  ;;  %s2898_s4 = smov [#allocation9]  }
 0x1ef   :  { %2795 = vtanh.f32 %v1145_v49  ;;  %v1317_v17 = vmul.f32 0.5, %v1253_v37  ;;  %v1321_v43 = vmul.f32 0.5, %v1257_v36  ;;  %v1252_v20 = vadd.f32 1.0, %v3741_v62  ;;  %s2256_s10 = sshll.u32 %s2898_s4, 4  ;;  %s2257_s10 = int_to_ptr.vmem [resolvable:$true] %s2256_s10 }
 0x1f0   :  { %v1453_v4 = vpack.c.bf16 %v1377_v16, %v1373_v48  ;;  %v1372_v47 = vmul.f32 %v1308_v60, %v3597_v61  ;;  %v1376_v38 = vmul.f32 %v1312_v27, %v3612_v59  ;;  %v1256_v8 = vadd.f32 1.0, %v3757_v7  ;;  %s2863_s11 = scalar_lea.vmem %s2257_s10, 4096  ;;  %p2868_p11 = scmp.lt.s32.totalorder %s2257_s10, %s2257_s10 }
 0x1f1   :  { %v1381_v25 = vmul.f32 %v1317_v17, %v3648_v46  ;;  %v1385_v32 = vmul.f32 %v1321_v43, %v3674_v39  ;;  %v1316_v15 = vmul.f32 0.5, %v1252_v20  ;;  %v1261_v24 = vadd.f32 1.0, %v2784_v52  ;;  %p2864_p10 = scmp.ne.s32.totalorder %s2257_s10, %s2863_s11  ;;  %p2869_p12 = scmp.lt.s32.totalorder %s2863_s11, %s2863_s11 }
 0x1f2   :  { %2035 = vmatprep.mubr.bf16.mxu0 %v1453_v4  ;;  %v1452_v33 = vpack.c.bf16 %v1376_v38, %v1372_v47  ;;  %v1320_v18 = vmul.f32 0.5, %v1256_v8  ;;  %v1265_v42 = vadd.f32 1.0, %v2788_v40  ;;  %v1260_v34 = vadd.f32 1.0, %v2782_v0 }
 0x1f3   :  { %v1457_v13 = vpack.c.bf16 %v1385_v32, %v1381_v25  ;;  %v1325_v62 = vmul.f32 0.5, %v1261_v24  ;;  %v1264_v2 = vadd.f32 1.0, %v2786_v41  ;;  %v1380_v61 = vmul.f32 %v1316_v15, %v3643_v44  ;;  %p2870_p13 = por %p2869_p12, %p2868_p11 }
 0x1f4   :  { %v2790_v63 = vpop.eup %2789  ;;  %v1384_v59 = vmul.f32 %v1320_v18, %v3662_v29  ;;  %v1329_v7 = vmul.f32 0.5, %v1265_v42  ;;  %v1324_v19 = vmul.f32 0.5, %v1260_v34  ;;  %v3821_v1 = vrot.slane %v2175_v10, %v182_v51 }
 0x1f5   :  { %2036 = vmatmul.mubr.bf16.gmra.mrb[16].mxu0 %v1452_v33  ;;  %v1328_v46 = vmul.f32 0.5, %v1264_v2  ;;  %v1268_v39 = vadd.f32 1.0, %v2790_v63  ;;  %v1389_v21 = vmul.f32 %v1325_v62, %v3703_v54  ;;  %p2871_p0 = pnand %p2870_p13, %p2864_p10 }
 0x1f6   :  { %2045 = vmatprep.mubr.bf16.mxu0 %v1457_v13  ;;  %v1456_v30 = vpack.c.bf16 %v1384_v59, %v1380_v61  ;;  %v1393_v28 = vmul.f32 %v1329_v7, %v3719_v45  ;;  %v1388_v12 = vmul.f32 %v1324_v19, %v3698_v3 }
 0x1f7   :  { %v2792_v57 = vpop.eup %2791  ;;  %v1392_v0 = vmul.f32 %v1328_v46, %v3712_v56  ;;  %v1332_v35 = vmul.f32 0.5, %v1268_v39 }
 0x1f8   :  { %v2794_v11 = vpop.eup %2793  ;;  %v1461_v44 = vpack.c.bf16 %v1393_v28, %v1389_v21  ;;  %v1269_v26 = vadd.f32 1.0, %v2792_v57 }
 0x1f9   :  { %v2796_v29 = vpop.eup %2795  ;;  %v1460_v31 = vpack.c.bf16 %v1392_v0, %v1388_v12  ;;  %v1272_v52 = vadd.f32 1.0, %v2794_v11  ;;  %v1396_v54 = vmul.f32 %v1332_v35, %v3750_v55  ;;  %v3825_v55 = vrot.slane %v2175_v10, %v186_v53 }
 0x1fa   :  { %v1273_v9 = vadd.f32 1.0, %v2796_v29  ;;  %v1333_v22 = vmul.f32 0.5, %v1269_v26 }
 0x1fb   :  { %v1336_v5 = vmul.f32 0.5, %v1272_v52 }
 0x1fc   :  { %v1337_v41 = vmul.f32 0.5, %v1273_v9  ;;  %v1397_v3 = vmul.f32 %v1333_v22, %v3761_v23 }
 0x1fd   :  { %2046 = vmatmul.mubr.bf16.gmra.mrb[20].mxu0 %v1456_v30  ;;  %v1400_v45 = vmul.f32 %v1336_v5, %v3765_v6 }
 0x1fe   :  { %2055 = vmatprep.mubr.bf16.mxu0 %v1461_v44  ;;  %v1401_v56 = vmul.f32 %v1337_v41, %v3770_v14 }
 0x1ff   :  { %v1464_v49 = vpack.c.bf16 %v1400_v45, %v1396_v54 }
 0x200   :  { %v1465_v58 = vpack.c.bf16 %v1401_v56, %v1397_v3 }
 0x205   :  { %2056 = vmatmul.mubr.bf16.gmra.mrb[24].mxu0 %v1460_v31 }
 0x206   :  { %2065 = vmatprep.mubr.bf16.mxu0 %v1465_v58 }
 0x20d   :  { %2066 = vmatmul.mubr.bf16.gmra.mrb[28].mxu0 %v1464_v49 }
 0x2a2   :  { %v1997_v23 = vpop.f32.mrb[0].mxu0 }
 0x2a3   :  { %v2187_v6 = vadd.f32 %v3821_v1, %v1997_v23  ;;  %v1999_v14 = vpop.f32.mrb[1].mxu0 }
 0x2a4   :  { %v2188_v40 = vadd.f32 %v3825_v55, %v1999_v14  ;;  %v2001_v48 = vpop.f32.mrb[2].mxu0 }
 0x2a5   :  { %2219 = vst [vmem:[#allocation9] sm:$0xff] %v2187_v6  ;;  %v2189_v37 = vadd.f32 %v3821_v1, %v2001_v48  ;;  %v2003_v36 = vpop.f32.mrb[3].mxu0 }
 0x2a6   :  { %2220 = vst [vmem:[#allocation9 + $0x8] sm:$0xff] %v2188_v40  ;;  %v2190_v16 = vadd.f32 %v3825_v55, %v2003_v36 }
 0x2a7   :  { %2221 = vst [vmem:[#allocation9 + $0x10] sm:$0xff] %v2189_v37 }
 0x2a8   :  { %2222 = vst [vmem:[#allocation9 + $0x18] sm:$0xff] %v2190_v16 }
 0x2ae   :  { %v2007_v51 = vpop.f32.mrb[4].mxu0 }
 0x2af   :  { %v2191_v50 = vadd.f32 %v3821_v1, %v2007_v51  ;;  %v2009_v53 = vpop.f32.mrb[5].mxu0 }
 0x2b0   :  { %v2192_v60 = vadd.f32 %v3825_v55, %v2009_v53  ;;  %v2011_v27 = vpop.f32.mrb[6].mxu0 }
 0x2b1   :  { %2223 = vst [vmem:[#allocation9 + $0x20] sm:$0xff] %v2191_v50  ;;  %v2193_v17 = vadd.f32 %v3821_v1, %v2011_v27  ;;  %v2013_v43 = vpop.f32.mrb[7].mxu0 }
 0x2b2   :  { %2224 = vst [vmem:[#allocation9 + $0x28] sm:$0xff] %v2192_v60  ;;  %v2194_v20 = vadd.f32 %v3825_v55, %v2013_v43 }
 0x2b3   :  { %2225 = vst [vmem:[#allocation9 + $0x30] sm:$0xff] %v2193_v17 }
 0x2b4   :  { %2226 = vst [vmem:[#allocation9 + $0x38] sm:$0xff] %v2194_v20 }
 0x2b7   :  { %v2017_v4 = vpop.f32.mrb[8].mxu0 }
 0x2b8   :  { %v2195_v47 = vadd.f32 %v3821_v1, %v2017_v4  ;;  %v2019_v38 = vpop.f32.mrb[9].mxu0 }
 0x2b9   :  { %v2196_v8 = vadd.f32 %v3825_v55, %v2019_v38  ;;  %v2021_v25 = vpop.f32.mrb[10].mxu0 }
 0x2ba   :  { %2227 = vst [vmem:[#allocation9 + $0x40] sm:$0xff] %v2195_v47  ;;  %v2197_v32 = vadd.f32 %v3821_v1, %v2021_v25  ;;  %v2023_v15 = vpop.f32.mrb[11].mxu0 }
 0x2bb   :  { %2228 = vst [vmem:[#allocation9 + $0x48] sm:$0xff] %v2196_v8  ;;  %v2198_v24 = vadd.f32 %v3825_v55, %v2023_v15 }
 0x2bc   :  { %2229 = vst [vmem:[#allocation9 + $0x50] sm:$0xff] %v2197_v32 }
 0x2bd   :  { %2230 = vst [vmem:[#allocation9 + $0x58] sm:$0xff] %v2198_v24 }
 0x2c0   :  { %v2027_v33 = vpop.f32.mrb[12].mxu0 }
 0x2c1   :  { %v2199_v18 = vadd.f32 %v3821_v1, %v2027_v33  ;;  %v2029_v42 = vpop.f32.mrb[13].mxu0 }
 0x2c2   :  { %v2200_v34 = vadd.f32 %v3825_v55, %v2029_v42  ;;  %v2031_v13 = vpop.f32.mrb[14].mxu0 }
 0x2c3   :  { %2231 = vst [vmem:[#allocation9 + $0x60] sm:$0xff] %v2199_v18  ;;  %v2201_v62 = vadd.f32 %v3821_v1, %v2031_v13  ;;  %v2033_v2 = vpop.f32.mrb[15].mxu0 }
 0x2c4   :  { %2232 = vst [vmem:[#allocation9 + $0x68] sm:$0xff] %v2200_v34  ;;  %v2202_v63 = vadd.f32 %v3825_v55, %v2033_v2 }
 0x2c5   :  { %2233 = vst [vmem:[#allocation9 + $0x70] sm:$0xff] %v2201_v62 }
 0x2c6   :  { %2234 = vst [vmem:[#allocation9 + $0x78] sm:$0xff] %v2202_v63 }
 0x2c8   :  { %v2037_v61 = vpop.f32.mrb[16].mxu0 }
 0x2c9   :  { %v2203_v59 = vadd.f32 %v3821_v1, %v2037_v61  ;;  %v2039_v7 = vpop.f32.mrb[17].mxu0 }
 0x2ca   :  { %v2204_v19 = vadd.f32 %v3825_v55, %v2039_v7  ;;  %v2041_v46 = vpop.f32.mrb[18].mxu0 }
 0x2cb   :  { %2235 = vst [vmem:[#allocation9 + $0x80] sm:$0xff] %v2203_v59  ;;  %v2205_v39 = vadd.f32 %v3821_v1, %v2041_v46  ;;  %v2043_v30 = vpop.f32.mrb[19].mxu0 }
 0x2cc   :  { %2236 = vst [vmem:[#allocation9 + $0x88] sm:$0xff] %v2204_v19  ;;  %v2206_v21 = vadd.f32 %v3825_v55, %v2043_v30 }
 0x2cd   :  { %2237 = vst [vmem:[#allocation9 + $0x90] sm:$0xff] %v2205_v39 }
 0x2ce   :  { %2238 = vst [vmem:[#allocation9 + $0x98] sm:$0xff] %v2206_v21 }
 0x2d0   :  { %v2047_v28 = vpop.f32.mrb[20].mxu0 }
 0x2d1   :  { %v2207_v57 = vadd.f32 %v3821_v1, %v2047_v28  ;;  %v2049_v12 = vpop.f32.mrb[21].mxu0 }
 0x2d2   :  { %v2208_v0 = vadd.f32 %v3825_v55, %v2049_v12  ;;  %v2051_v11 = vpop.f32.mrb[22].mxu0 }
 0x2d3   :  { %2239 = vst [vmem:[#allocation9 + $0xa0] sm:$0xff] %v2207_v57  ;;  %v2209_v44 = vadd.f32 %v3821_v1, %v2051_v11  ;;  %v2053_v26 = vpop.f32.mrb[23].mxu0 }
 0x2d4   :  { %2240 = vst [vmem:[#allocation9 + $0xa8] sm:$0xff] %v2208_v0  ;;  %v2210_v29 = vadd.f32 %v3825_v55, %v2053_v26 }
 0x2d5   :  { %2241 = vst [vmem:[#allocation9 + $0xb0] sm:$0xff] %v2209_v44 }
 0x2d6   :  { %2242 = vst [vmem:[#allocation9 + $0xb8] sm:$0xff] %v2210_v29 }
 0x2d8   :  { %v2057_v31 = vpop.f32.mrb[24].mxu0 }
 0x2d9   :  { %v2211_v52 = vadd.f32 %v3821_v1, %v2057_v31  ;;  %v2059_v35 = vpop.f32.mrb[25].mxu0 }
 0x2da   :  { %v2212_v9 = vadd.f32 %v3825_v55, %v2059_v35  ;;  %v2061_v22 = vpop.f32.mrb[26].mxu0 }
 0x2db   :  { %2243 = vst [vmem:[#allocation9 + $0xc0] sm:$0xff] %v2211_v52  ;;  %v2213_v5 = vadd.f32 %v3821_v1, %v2061_v22  ;;  %v2063_v41 = vpop.f32.mrb[27].mxu0 }
 0x2dc   :  { %2244 = vst [vmem:[#allocation9 + $0xc8] sm:$0xff] %v2212_v9  ;;  %v2214_v54 = vadd.f32 %v3825_v55, %v2063_v41 }
 0x2dd   :  { %2245 = vst [vmem:[#allocation9 + $0xd0] sm:$0xff] %v2213_v5 }
 0x2de   :  { %2246 = vst [vmem:[#allocation9 + $0xd8] sm:$0xff] %v2214_v54 }
 0x2e0   :  { %v2067_v45 = vpop.f32.mrb[28].mxu0 }
 0x2e1   :  { %v2215_v3 = vadd.f32 %v3821_v1, %v2067_v45  ;;  %v2069_v56 = vpop.f32.mrb[29].mxu0 }
 0x2e2   :  { %v2216_v49 = vadd.f32 %v3825_v55, %v2069_v56  ;;  %v2071_v58 = vpop.f32.mrb[30].mxu0 }
 0x2e3   :  { %2247 = vst [vmem:[#allocation9 + $0xe0] sm:$0xff] %v2215_v3  ;;  %v2217_v10 = vadd.f32 %v3821_v1, %v2071_v58  ;;  %v2073_v23 = vpop.f32.mrb[31].mxu0 }
 0x2e4   :  { %2248 = vst [vmem:[#allocation9 + $0xe8] sm:$0xff] %v2216_v49  ;;  %v2218_v6 = vadd.f32 %v3825_v55, %v2073_v23 }
 0x2e5   :  { %2249 = vst [vmem:[#allocation9 + $0xf0] sm:$0xff] %v2217_v10 }
 0x2e6   :  { %2250 = vst [vmem:[#allocation9 + $0xf8] sm:$0xff] %v2218_v6 }
 0x2e7   :  { %2874 = shalt.err (!%p2871_p0)
}
 0x2e8   :  { %s2875_s14 = scalar_lea.hbm %s3879_s5, 4096 }
 0x2e9   :  { %p2876_p1 = scmp.ne.s32.totalorder %s3879_s5, %s2875_s14  ;;  %p2879_p2 = scmp.lt.u32.totalorder %s2875_s14, %s3879_s5 }
 0x2eb   :  { %p2881_p3 = pnand %p2879_p2, %p2876_p1 }
 0x2ed   :  { %2884 = shalt.err (!%p2881_p3)
}
 0x2ee   :  { %2262 = dma.vmem_to_hbm [thread:$0]  %s2257_s10, 4096, %s3879_s5, [#allocation5], %s2892_s28, %s2892_s28, %s2893_s29  }
 0x2ef   :  { %2889 = dma.done.wait [#allocation5], 4096  }
 0x2f0   :  { %2890 = vsyncadd [#allocation5], 4294963200 }
 0x2f1   :  { %2266 = vsyncpa [#allocation4], 1 }
 0x2f2   :  { %2267 = vsyncpa [#allocation7], 1 }
 0x2f3   :  { %2268 = vsyncpa [#allocation5], 1 }

</bundles_post_ra>
